<compile_context>
chip_gen: v5e
topology: v5e:2x2
jax: 0.10.0
libtpu: 0.0.40
codegen_flags: <defaults>
</compile_context>

<pallas_src>
import functools

import jax
import jax.numpy as jnp
from jax.experimental import pallas as pl
from jax.experimental.pallas import tpu as pltpu

LANE = 128


def _round_up(v, m):
    return (v + m - 1) // m * m


# ---------------- fused maxpool + conv3x3 + BN + ReLU kernel -----------------
def _fused_down_kernel(x_ref, w_ref, shift_ref, o_ref, pext_ref, patch_ref,
                       *, cin, hpp, wpp, base):
    """One grid step = one image.

    x_ref:     (4, Mp, Cin)  f32   the 4 taps of every 2x2 pool window, flattened
                                   over the zero-ring-padded pooled grid (Mp=Hpp*Wpp).
    w_ref:     (9*Cin, Npad) bf16  conv weight with BN scale folded in, Cout padded to 128.
    shift_ref: (1, Npad)     f32   folded conv bias + BN shift.
    o_ref:     (Mp, Npad)    f32   lane-dense output rows (ring + lane pad dropped outside).
    pext_ref:  (Lext, Cin)   f32   scratch: pooled map with zero halo rows.
    patch_ref: (Mp, 9*Cin)   bf16  scratch: im2col slab fed to the MXU.
    """
    mp = hpp * wpp
    lext = pext_ref.shape[0]

    # 2x2 max-pool: elementwise max of the 4 pre-gathered window taps (f32, VPU).
    pooled = jnp.maximum(jnp.maximum(x_ref[0], x_ref[1]),
                         jnp.maximum(x_ref[2], x_ref[3]))              # (Mp, Cin)

    # Row-extended pooled map in scratch: zero only the halo rows, write the
    # pooled interior at an 8-aligned sublane offset (no concatenate copy).
    pext_ref[0:base, :] = jnp.zeros((base, cin), pext_ref.dtype)
    pext_ref[base:base + mp, :] = pooled
    tail = lext - (base + mp)
    if tail > 0:
        pext_ref[base + mp:lext, :] = jnp.zeros((tail, cin), pext_ref.dtype)

    # Build the (Mp, 9*Cin) bf16 im2col slab: every 3x3 tap is a contiguous
    # row-slice of pext written into its own lane block of the slab.
    # TODO(synk): the kw=+-1 slices are sublane-unaligned; a pltpu.roll of the
    #             aligned center slab would shave the remaining relayout copies.
    for kh in range(3):
        for kw in range(3):
            t = kh * 3 + kw
            off = base - (wpp + 1) + kh * wpp + kw
            patch_ref[:, t * cin:(t + 1) * cin] = (
                pext_ref[off:off + mp, :].astype(patch_ref.dtype))

    # One deep-K MXU matmul (bf16 in, f32 accumulate); folded shift + ReLU epilogue.
    y = jnp.dot(patch_ref[...], w_ref[...], preferred_element_type=jnp.float32)
    o_ref[...] = jnp.maximum(y + shift_ref[...], 0.0).astype(o_ref.dtype)


# --------------------------------- wrapper -----------------------------------
def down_block_forward(x_nchw, params, eps=1e-5):
    """x: (B, Cin, H, W) -> (B, Cout, H/2, W/2), matching the PyTorch block."""
    B, Cin, H, W = x_nchw.shape
    assert H % 2 == 0 and W % 2 == 0, "even spatial dims required (as in UTANet)"
    Cout = params["w"].shape[0]
    Hp, Wp = H // 2, W // 2
    Hpp, Wpp = Hp + 2, Wp + 2                      # pooled grid + conv zero ring
    Mp = Hpp * Wpp
    Npad = _round_up(max(Cout, LANE), LANE)        # lane-dense output width
    base = _round_up(Wpp + 1, 8)                   # 8-aligned pooled-interior start
    Lext = _round_up(base + Mp + Wpp + 1, 8)       # covers the largest tap slice end

    # ---- layout glue: one HBM rearrangement of x (XLA fuses transpose/pad/reshape) ----
    # Padding x by 2 per side means pooling the padded image yields the pooled
    # map WITH the conv's zero ring already in place (interior windows never mix
    # padding with real values).
    x = jnp.transpose(x_nchw, (0, 2, 3, 1))                          # NCHW -> NHWC
    xpad = jnp.pad(x, ((0, 0), (2, 2), (2, 2), (0, 0)))              # (B, 2*Hpp, 2*Wpp, Cin)
    xr = xpad.reshape(B, Hpp, 2, Wpp, 2, Cin)
    xr = jnp.transpose(xr, (0, 2, 4, 1, 3, 5)).reshape(B, 4, Mp, Cin)

    # ---- fold conv bias + inference BatchNorm into weight columns / shift ----
    scale = params["gamma"] / jnp.sqrt(params["running_var"] + eps)
    shift = params["beta"] - params["running_mean"] * scale + params["b"] * scale
    w_mat = jnp.transpose(params["w"], (2, 3, 1, 0)).reshape(9 * Cin, Cout)
    w_mat = (w_mat * scale[None, :]).astype(jnp.bfloat16)            # bf16 MXU operand
    w_pad = jnp.zeros((9 * Cin, Npad), jnp.bfloat16).at[:, :Cout].set(w_mat)
    shift_pad = jnp.zeros((1, Npad), jnp.float32).at[0, :Cout].set(
        shift.astype(jnp.float32))

    kernel = functools.partial(_fused_down_kernel, cin=Cin, hpp=Hpp, wpp=Wpp, base=base)

    # ---- VMEM budget: double-buffered in/out blocks + weight/shift + scratches
    #      + in-kernel temporaries (pooled map, f32 matmul result). -------------
    est = (2 * (4 * Mp * Cin * 4 + Mp * Npad * 4)          # x / out blocks (x2 buffers)
           + 9 * Cin * Npad * 2 + Npad * 4                 # folded weight (bf16) + shift
           + Lext * Cin * 4 + Mp * 9 * Cin * 2             # pext + im2col scratches
           + Mp * Cin * 4 + Mp * Npad * 4)                 # pooled + f32 dot result
    try:
        cap = int(getattr(pltpu.get_tpu_info(), "vmem_capacity_bytes",
                          64 * 1024 * 1024))
    except Exception:
        cap = 64 * 1024 * 1024                             # conservative (v7x per-TC)
    vmem_limit = int(min(max(2 * est, 16 * 1024 * 1024), int(cap * 0.9)))
    # TODO(synk): if 2*est exceeds the per-generation cap (huge feature maps on
    #             v7x) the fix is a pooled-row tile grid axis, not a tighter clamp.

    out_shape = jax.ShapeDtypeStruct((B, Mp, Npad), x.dtype)
    scratch_shapes = [pltpu.VMEM((Lext, Cin), jnp.float32),
                      pltpu.VMEM((Mp, 9 * Cin), jnp.bfloat16)]

    def build(single_buffer_consts):
        const_kw = {"pipeline_mode": pl.Buffered(1)} if single_buffer_consts else {}
        in_specs = [
            pl.BlockSpec((None, 4, Mp, Cin), lambda b: (b, 0, 0, 0)),   # per-image taps
            pl.BlockSpec((9 * Cin, Npad), lambda b: (0, 0), **const_kw),  # folded weight
            pl.BlockSpec((1, Npad), lambda b: (0, 0), **const_kw),       # folded shift
        ]
        return pl.pallas_call(
            kernel,
            out_shape=out_shape,
            grid=(B,),
            in_specs=in_specs,
            out_specs=pl.BlockSpec((None, Mp, Npad), lambda b: (b, 0, 0)),
            scratch_shapes=scratch_shapes,
            compiler_params=pltpu.CompilerParams(
                dimension_semantics=("parallel",),   # shards batch across v7x's 2 TCs
                vmem_limit_bytes=vmem_limit,
            ),
        )

    try:
        out = jax.block_until_ready(build(True)(xr, w_pad, shift_pad))
    except Exception:
        # pipeline_mode=pl.Buffered(1) not supported on this jax version: fall
        # back to default double-buffering of the (constant) weight/shift tiles.
        out = jax.block_until_ready(build(False)(xr, w_pad, shift_pad))

    # Drop the zero ring and the lane padding, back to NCHW.
    out = out.reshape(B, Hpp, Wpp, Npad)[:, 1:-1, 1:-1, :Cout]       # (B, Hp, Wp, Cout)
    return jnp.transpose(out, (0, 3, 1, 2))


# ------------------------------ pure-JAX reference ----------------------------
def reference_forward(x_nchw, p, eps=1e-5, compute_dtype=jnp.float32):
    """Reference pool->conv->BN->ReLU. compute_dtype=bf16 mirrors the kernel's
    bf16 MXU operands (f32 accumulation); f32 is the exact torch-semantics path."""
    pooled = jax.lax.reduce_window(
        x_nchw, -jnp.inf, jax.lax.max, (1, 1, 2, 2), (1, 1, 2, 2), "VALID")
    scale = p["gamma"] / jnp.sqrt(p["running_var"] + eps)
    shift = p["beta"] - p["running_mean"] * scale + p["b"] * scale
    w_fold = p["w"] * scale[:, None, None, None]
    conv = jax.lax.conv_general_dilated(
        pooled.astype(compute_dtype), w_fold.astype(compute_dtype),
        (1, 1), ((1, 1), (1, 1)),
        dimension_numbers=("NCHW", "OIHW", "NCHW"),
        preferred_element_type=jnp.float32,
        precision=jax.lax.Precision.HIGHEST)
    y = conv + shift[None, :, None, None]
    return jnp.maximum(y, 0.0)


# ---------------------------------- main --------------------------------------
if __name__ == "__main__":
    key = jax.random.PRNGKey(0)
    k_x, k_w, k_b, k_m, k_v = jax.random.split(key, 5)

    B, in_ch, out_ch, H, W = 2, 4, 8, 16, 16

    x = jax.random.normal(k_x, (B, in_ch, H, W), dtype=jnp.float32)

    params = {
        "w": 0.1 * jax.random.normal(k_w, (out_ch, in_ch, 3, 3), dtype=jnp.float32),
        "b": 0.1 * jax.random.normal(k_b, (out_ch,), dtype=jnp.float32),
        "gamma": jnp.linspace(0.5, 1.5, out_ch, dtype=jnp.float32),
        "beta": jnp.linspace(-0.1, 0.1, out_ch, dtype=jnp.float32),
        "running_mean": 0.1 * jax.random.normal(k_m, (out_ch,), dtype=jnp.float32),
        "running_var": 0.5 + 0.5 * jnp.abs(jax.random.normal(k_v, (out_ch,), dtype=jnp.float32)),
    }

    out = jax.block_until_ready(down_block_forward(x, params))
    ref_bf16 = jax.block_until_ready(
        reference_forward(x, params, compute_dtype=jnp.bfloat16))
    ref_f32 = jax.block_until_ready(
        reference_forward(x, params, compute_dtype=jnp.float32))

    assert out.shape == (B, out_ch, H // 2, W // 2), out.shape
    assert jnp.all(jnp.isfinite(out))
    # Precision-matched check (kernel uses bf16 MXU operands, f32 accumulation).
    assert jnp.allclose(out, ref_bf16, atol=1e-3, rtol=1e-3), \
        float(jnp.max(jnp.abs(out - ref_bf16)))
    # Sanity check against the full-f32 reference (bf16 rounding tolerance).
    assert jnp.allclose(out, ref_f32, atol=3e-2, rtol=3e-2), \
        float(jnp.max(jnp.abs(out - ref_f32)))

    print("KERNEL_OK")
</pallas_src>

<mosaic_0001>
module attributes {stable_mosaic.version = 11 : i64} {
  func.func @_fused_down_kernel(%arg0: i32, %arg1: memref<1x4x100x4xf32, #tpu.memory_space<vmem>>, %arg2: memref<36x128xbf16, #tpu.memory_space<vmem>>, %arg3: memref<1x128xf32, #tpu.memory_space<vmem>>, %arg4: memref<1x100x128xf32, #tpu.memory_space<vmem>>, %arg5: memref<128x4xf32, #tpu.memory_space<vmem>>, %arg6: memref<100x36xbf16, #tpu.memory_space<vmem>>) attributes {dimension_semantics = [#tpu.dimension_semantics<parallel>], iteration_bounds = array<i64: 2>, scalar_prefetch = 0 : i64, scratch_operands = 2 : i64, tpu.core_type = #tpu.core_type<tc>, window_params = [{transform_indices = @transform_0, window_bounds = array<i64: 1, 4, 100, 4>}, {pipeline_mode = #tpu.pipeline_mode<synchronous>, transform_indices = @transform_1, window_bounds = array<i64: 36, 128>}, {pipeline_mode = #tpu.pipeline_mode<synchronous>, transform_indices = @transform_2, window_bounds = array<i64: 1, 128>}, {transform_indices = @transform_3, window_bounds = array<i64: 1, 100, 128>}]} {
    %c0 = arith.constant 0 : index
    %c0_0 = arith.constant 0 : index
    %c0_1 = arith.constant 0 : index
    %c0_2 = arith.constant 0 : index
    %0 = vector.load %arg1[%c0, %c0_0, %c0_1, %c0_2] : memref<1x4x100x4xf32, #tpu.memory_space<vmem>>, vector<1x1x100x4xf32>
    %1 = vector.shape_cast %0 : vector<1x1x100x4xf32> to vector<100x4xf32>
    %c0_3 = arith.constant 0 : index
    %c1 = arith.constant 1 : index
    %c0_4 = arith.constant 0 : index
    %c0_5 = arith.constant 0 : index
    %2 = vector.load %arg1[%c0_3, %c1, %c0_4, %c0_5] : memref<1x4x100x4xf32, #tpu.memory_space<vmem>>, vector<1x1x100x4xf32>
    %3 = vector.shape_cast %2 : vector<1x1x100x4xf32> to vector<100x4xf32>
    %4 = arith.maximumf %1, %3 : vector<100x4xf32>
    %c0_6 = arith.constant 0 : index
    %c2 = arith.constant 2 : index
    %c0_7 = arith.constant 0 : index
    %c0_8 = arith.constant 0 : index
    %5 = vector.load %arg1[%c0_6, %c2, %c0_7, %c0_8] : memref<1x4x100x4xf32, #tpu.memory_space<vmem>>, vector<1x1x100x4xf32>
    %6 = vector.shape_cast %5 : vector<1x1x100x4xf32> to vector<100x4xf32>
    %c0_9 = arith.constant 0 : index
    %c3 = arith.constant 3 : index
    %c0_10 = arith.constant 0 : index
    %c0_11 = arith.constant 0 : index
    %7 = vector.load %arg1[%c0_9, %c3, %c0_10, %c0_11] : memref<1x4x100x4xf32, #tpu.memory_space<vmem>>, vector<1x1x100x4xf32>
    %8 = vector.shape_cast %7 : vector<1x1x100x4xf32> to vector<100x4xf32>
    %9 = arith.maximumf %6, %8 : vector<100x4xf32>
    %10 = arith.maximumf %4, %9 : vector<100x4xf32>
    %cst = arith.constant 0.000000e+00 : f32
    %11 = vector.broadcast %cst : f32 to vector<16x4xf32>
    %c0_12 = arith.constant 0 : index
    %c0_13 = arith.constant 0 : index
    %12 = vector.load %arg5[%c0_12, %c0_13] : memref<128x4xf32, #tpu.memory_space<vmem>>, vector<16x4xf32>
    tpu.vector_store %arg5[%c0_12, %c0_13], %11 {strides = array<i32>} : memref<128x4xf32, #tpu.memory_space<vmem>>, vector<16x4xf32>,
    %c16 = arith.constant 16 : index
    %c0_14 = arith.constant 0 : index
    %13 = vector.load %arg5[%c16, %c0_14] : memref<128x4xf32, #tpu.memory_space<vmem>>, vector<100x4xf32>
    tpu.vector_store %arg5[%c16, %c0_14], %10 {strides = array<i32>} : memref<128x4xf32, #tpu.memory_space<vmem>>, vector<100x4xf32>,
    %cst_15 = arith.constant 0.000000e+00 : f32
    %14 = vector.broadcast %cst_15 : f32 to vector<12x4xf32>
    %c116 = arith.constant 116 : index
    %c0_16 = arith.constant 0 : index
    %15 = vector.load %arg5[%c116, %c0_16] : memref<128x4xf32, #tpu.memory_space<vmem>>, vector<12x4xf32>
    tpu.vector_store %arg5[%c116, %c0_16], %14 {strides = array<i32>} : memref<128x4xf32, #tpu.memory_space<vmem>>, vector<12x4xf32>,
    %c5 = arith.constant 5 : index
    %c0_17 = arith.constant 0 : index
    %16 = vector.load %arg5[%c5, %c0_17] : memref<128x4xf32, #tpu.memory_space<vmem>>, vector<100x4xf32>
    %17 = arith.truncf %16 : vector<100x4xf32> to vector<100x4xbf16>
    %c0_18 = arith.constant 0 : index
    %c0_19 = arith.constant 0 : index
    %18 = vector.load %arg6[%c0_18, %c0_19] : memref<100x36xbf16, #tpu.memory_space<vmem>>, vector<100x4xbf16>
    tpu.vector_store %arg6[%c0_18, %c0_19], %17 {strides = array<i32>} : memref<100x36xbf16, #tpu.memory_space<vmem>>, vector<100x4xbf16>,
    %c6 = arith.constant 6 : index
    %c0_20 = arith.constant 0 : index
    %19 = vector.load %arg5[%c6, %c0_20] : memref<128x4xf32, #tpu.memory_space<vmem>>, vector<100x4xf32>
    %20 = arith.truncf %19 : vector<100x4xf32> to vector<100x4xbf16>
    %c0_21 = arith.constant 0 : index
    %c4 = arith.constant 4 : index
    %21 = vector.load %arg6[%c0_21, %c4] : memref<100x36xbf16, #tpu.memory_space<vmem>>, vector<100x4xbf16>
    tpu.vector_store %arg6[%c0_21, %c4], %20 {strides = array<i32>} : memref<100x36xbf16, #tpu.memory_space<vmem>>, vector<100x4xbf16>,
    %c7 = arith.constant 7 : index
    %c0_22 = arith.constant 0 : index
    %22 = vector.load %arg5[%c7, %c0_22] : memref<128x4xf32, #tpu.memory_space<vmem>>, vector<100x4xf32>
    %23 = arith.truncf %22 : vector<100x4xf32> to vector<100x4xbf16>
    %c0_23 = arith.constant 0 : index
    %c8 = arith.constant 8 : index
    %24 = vector.load %arg6[%c0_23, %c8] : memref<100x36xbf16, #tpu.memory_space<vmem>>, vector<100x4xbf16>
    tpu.vector_store %arg6[%c0_23, %c8], %23 {strides = array<i32>} : memref<100x36xbf16, #tpu.memory_space<vmem>>, vector<100x4xbf16>,
    %c15 = arith.constant 15 : index
    %c0_24 = arith.constant 0 : index
    %25 = vector.load %arg5[%c15, %c0_24] : memref<128x4xf32, #tpu.memory_space<vmem>>, vector<100x4xf32>
    %26 = arith.truncf %25 : vector<100x4xf32> to vector<100x4xbf16>
    %c0_25 = arith.constant 0 : index
    %c12 = arith.constant 12 : index
    %27 = vector.load %arg6[%c0_25, %c12] : memref<100x36xbf16, #tpu.memory_space<vmem>>, vector<100x4xbf16>
    tpu.vector_store %arg6[%c0_25, %c12], %26 {strides = array<i32>} : memref<100x36xbf16, #tpu.memory_space<vmem>>, vector<100x4xbf16>,
    %c16_26 = arith.constant 16 : index
    %c0_27 = arith.constant 0 : index
    %28 = vector.load %arg5[%c16_26, %c0_27] : memref<128x4xf32, #tpu.memory_space<vmem>>, vector<100x4xf32>
    %29 = arith.truncf %28 : vector<100x4xf32> to vector<100x4xbf16>
    %c0_28 = arith.constant 0 : index
    %c16_29 = arith.constant 16 : index
    %30 = vector.load %arg6[%c0_28, %c16_29] : memref<100x36xbf16, #tpu.memory_space<vmem>>, vector<100x4xbf16>
    tpu.vector_store %arg6[%c0_28, %c16_29], %29 {strides = array<i32>} : memref<100x36xbf16, #tpu.memory_space<vmem>>, vector<100x4xbf16>,
    %c17 = arith.constant 17 : index
    %c0_30 = arith.constant 0 : index
    %31 = vector.load %arg5[%c17, %c0_30] : memref<128x4xf32, #tpu.memory_space<vmem>>, vector<100x4xf32>
    %32 = arith.truncf %31 : vector<100x4xf32> to vector<100x4xbf16>
    %c0_31 = arith.constant 0 : index
    %c20 = arith.constant 20 : index
    %33 = vector.load %arg6[%c0_31, %c20] : memref<100x36xbf16, #tpu.memory_space<vmem>>, vector<100x4xbf16>
    tpu.vector_store %arg6[%c0_31, %c20], %32 {strides = array<i32>} : memref<100x36xbf16, #tpu.memory_space<vmem>>, vector<100x4xbf16>,
    %c25 = arith.constant 25 : index
    %c0_32 = arith.constant 0 : index
    %34 = vector.load %arg5[%c25, %c0_32] : memref<128x4xf32, #tpu.memory_space<vmem>>, vector<100x4xf32>
    %35 = arith.truncf %34 : vector<100x4xf32> to vector<100x4xbf16>
    %c0_33 = arith.constant 0 : index
    %c24 = arith.constant 24 : index
    %36 = vector.load %arg6[%c0_33, %c24] : memref<100x36xbf16, #tpu.memory_space<vmem>>, vector<100x4xbf16>
    tpu.vector_store %arg6[%c0_33, %c24], %35 {strides = array<i32>} : memref<100x36xbf16, #tpu.memory_space<vmem>>, vector<100x4xbf16>,
    %c26 = arith.constant 26 : index
    %c0_34 = arith.constant 0 : index
    %37 = vector.load %arg5[%c26, %c0_34] : memref<128x4xf32, #tpu.memory_space<vmem>>, vector<100x4xf32>
    %38 = arith.truncf %37 : vector<100x4xf32> to vector<100x4xbf16>
    %c0_35 = arith.constant 0 : index
    %c28 = arith.constant 28 : index
    %39 = vector.load %arg6[%c0_35, %c28] : memref<100x36xbf16, #tpu.memory_space<vmem>>, vector<100x4xbf16>
    tpu.vector_store %arg6[%c0_35, %c28], %38 {strides = array<i32>} : memref<100x36xbf16, #tpu.memory_space<vmem>>, vector<100x4xbf16>,
    %c27 = arith.constant 27 : index
    %c0_36 = arith.constant 0 : index
    %40 = vector.load %arg5[%c27, %c0_36] : memref<128x4xf32, #tpu.memory_space<vmem>>, vector<100x4xf32>
    %41 = arith.truncf %40 : vector<100x4xf32> to vector<100x4xbf16>
    %c0_37 = arith.constant 0 : index
    %c32 = arith.constant 32 : index
    %42 = vector.load %arg6[%c0_37, %c32] : memref<100x36xbf16, #tpu.memory_space<vmem>>, vector<100x4xbf16>
    tpu.vector_store %arg6[%c0_37, %c32], %41 {strides = array<i32>} : memref<100x36xbf16, #tpu.memory_space<vmem>>, vector<100x4xbf16>,
    %c0_38 = arith.constant 0 : index
    %c0_39 = arith.constant 0 : index
    %43 = vector.load %arg6[%c0_38, %c0_39] : memref<100x36xbf16, #tpu.memory_space<vmem>>, vector<100x36xbf16>
    %c0_40 = arith.constant 0 : index
    %c0_41 = arith.constant 0 : index
    %44 = vector.load %arg2[%c0_40, %c0_41] : memref<36x128xbf16, #tpu.memory_space<vmem>>, vector<36x128xbf16>
    %cst_42 = arith.constant dense<0.000000e+00> : vector<100x128xf32>
    %45 = tpu.matmul %43, %44, %cst_42 {dimension_numbers = #tpu.dot_dimension_numbers<[1], [0], [0], [1], [0, 0, 1, 1], [], []>} : vector<100x36xbf16>, vector<36x128xbf16>, vector<100x128xf32> -> vector<100x128xf32>
    %c0_43 = arith.constant 0 : index
    %c0_44 = arith.constant 0 : index
    %46 = vector.load %arg3[%c0_43, %c0_44] : memref<1x128xf32, #tpu.memory_space<vmem>>, vector<1x128xf32>
    %47 = vector.broadcast %46 : vector<1x128xf32> to vector<100x128xf32>
    %48 = arith.addf %45, %47 : vector<100x128xf32>
    %cst_45 = arith.constant 0.000000e+00 : f32
    %49 = vector.broadcast %cst_45 : f32 to vector<100x128xf32>
    %50 = arith.maximumf %48, %49 : vector<100x128xf32>
    %c0_46 = arith.constant 0 : index
    %c0_47 = arith.constant 0 : index
    %c0_48 = arith.constant 0 : index
    %51 = vector.load %arg4[%c0_46, %c0_47, %c0_48] : memref<1x100x128xf32, #tpu.memory_space<vmem>>, vector<1x100x128xf32>
    %52 = vector.shape_cast %51 : vector<1x100x128xf32> to vector<100x128xf32>
    %53 = vector.shape_cast %50 : vector<100x128xf32> to vector<1x100x128xf32>
    tpu.vector_store %arg4[%c0_46, %c0_47, %c0_48], %53 {strides = array<i32>} : memref<1x100x128xf32, #tpu.memory_space<vmem>>, vector<1x100x128xf32>,
    return
  }
  func.func @transform_0(%arg0: i32) -> (i32, i32, i32, i32) {
    %c0_i32 = arith.constant 0 : i32
    %c0_i32_0 = arith.constant 0 : i32
    %c0_i32_1 = arith.constant 0 : i32
    %c0_i32_2 = arith.constant 0 : i32
    return %arg0, %c0_i32, %c0_i32_0, %c0_i32_1 : i32, i32, i32, i32
  }
  func.func @transform_1(%arg0: i32) -> (i32, i32) {
    %c0_i32 = arith.constant 0 : i32
    %c0_i32_0 = arith.constant 0 : i32
    %c0_i32_1 = arith.constant 0 : i32
    return %c0_i32, %c0_i32_0 : i32, i32
  }
  func.func @transform_2(%arg0: i32) -> (i32, i32) {
    %c0_i32 = arith.constant 0 : i32
    %c0_i32_0 = arith.constant 0 : i32
    %c0_i32_1 = arith.constant 0 : i32
    return %c0_i32, %c0_i32_0 : i32, i32
  }
  func.func @transform_3(%arg0: i32) -> (i32, i32, i32) {
    %c0_i32 = arith.constant 0 : i32
    %c0_i32_0 = arith.constant 0 : i32
    %c0_i32_1 = arith.constant 0 : i32
    return %arg0, %c0_i32, %c0_i32_0 : i32, i32, i32
  }
}

module attributes {stable_mosaic.version = 11 : i64} {
  func.func @_fused_down_kernel(%arg0: i32, %arg1: memref<1x4x100x4xf32, #tpu.memory_space<vmem>>, %arg2: memref<36x128xbf16, #tpu.memory_space<vmem>>, %arg3: memref<1x128xf32, #tpu.memory_space<vmem>>, %arg4: memref<1x100x128xf32, #tpu.memory_space<vmem>>, %arg5: memref<128x4xf32, #tpu.memory_space<vmem>>, %arg6: memref<100x36xbf16, #tpu.memory_space<vmem>>) attributes {dimension_semantics = [#tpu.dimension_semantics<parallel>], iteration_bounds = array<i64: 2>, scalar_prefetch = 0 : i64, scratch_operands = 2 : i64, tpu.core_type = #tpu.core_type<tc>, window_params = [{transform_indices = @transform_0, window_bounds = array<i64: 1, 4, 100, 4>}, {pipeline_mode = #tpu.pipeline_mode<synchronous>, transform_indices = @transform_1, window_bounds = array<i64: 36, 128>}, {pipeline_mode = #tpu.pipeline_mode<synchronous>, transform_indices = @transform_2, window_bounds = array<i64: 1, 128>}, {transform_indices = @transform_3, window_bounds = array<i64: 1, 100, 128>}]} {
    %c0 = arith.constant 0 : index
    %c0_0 = arith.constant 0 : index
    %c0_1 = arith.constant 0 : index
    %c0_2 = arith.constant 0 : index
    %0 = vector.load %arg1[%c0, %c0_0, %c0_1, %c0_2] : memref<1x4x100x4xf32, #tpu.memory_space<vmem>>, vector<1x1x100x4xf32>
    %1 = vector.shape_cast %0 : vector<1x1x100x4xf32> to vector<100x4xf32>
    %c0_3 = arith.constant 0 : index
    %c1 = arith.constant 1 : index
    %c0_4 = arith.constant 0 : index
    %c0_5 = arith.constant 0 : index
    %2 = vector.load %arg1[%c0_3, %c1, %c0_4, %c0_5] : memref<1x4x100x4xf32, #tpu.memory_space<vmem>>, vector<1x1x100x4xf32>
    %3 = vector.shape_cast %2 : vector<1x1x100x4xf32> to vector<100x4xf32>
    %4 = arith.maximumf %1, %3 : vector<100x4xf32>
    %c0_6 = arith.constant 0 : index
    %c2 = arith.constant 2 : index
    %c0_7 = arith.constant 0 : index
    %c0_8 = arith.constant 0 : index
    %5 = vector.load %arg1[%c0_6, %c2, %c0_7, %c0_8] : memref<1x4x100x4xf32, #tpu.memory_space<vmem>>, vector<1x1x100x4xf32>
    %6 = vector.shape_cast %5 : vector<1x1x100x4xf32> to vector<100x4xf32>
    %c0_9 = arith.constant 0 : index
    %c3 = arith.constant 3 : index
    %c0_10 = arith.constant 0 : index
    %c0_11 = arith.constant 0 : index
    %7 = vector.load %arg1[%c0_9, %c3, %c0_10, %c0_11] : memref<1x4x100x4xf32, #tpu.memory_space<vmem>>, vector<1x1x100x4xf32>
    %8 = vector.shape_cast %7 : vector<1x1x100x4xf32> to vector<100x4xf32>
    %9 = arith.maximumf %6, %8 : vector<100x4xf32>
    %10 = arith.maximumf %4, %9 : vector<100x4xf32>
    %cst = arith.constant 0.000000e+00 : f32
    %11 = vector.broadcast %cst : f32 to vector<16x4xf32>
    %c0_12 = arith.constant 0 : index
    %c0_13 = arith.constant 0 : index
    %12 = vector.load %arg5[%c0_12, %c0_13] : memref<128x4xf32, #tpu.memory_space<vmem>>, vector<16x4xf32>
    tpu.vector_store %arg5[%c0_12, %c0_13], %11 {strides = array<i32>} : memref<128x4xf32, #tpu.memory_space<vmem>>, vector<16x4xf32>,
    %c16 = arith.constant 16 : index
    %c0_14 = arith.constant 0 : index
    %13 = vector.load %arg5[%c16, %c0_14] : memref<128x4xf32, #tpu.memory_space<vmem>>, vector<100x4xf32>
    tpu.vector_store %arg5[%c16, %c0_14], %10 {strides = array<i32>} : memref<128x4xf32, #tpu.memory_space<vmem>>, vector<100x4xf32>,
    %cst_15 = arith.constant 0.000000e+00 : f32
    %14 = vector.broadcast %cst_15 : f32 to vector<12x4xf32>
    %c116 = arith.constant 116 : index
    %c0_16 = arith.constant 0 : index
    %15 = vector.load %arg5[%c116, %c0_16] : memref<128x4xf32, #tpu.memory_space<vmem>>, vector<12x4xf32>
    tpu.vector_store %arg5[%c116, %c0_16], %14 {strides = array<i32>} : memref<128x4xf32, #tpu.memory_space<vmem>>, vector<12x4xf32>,
    %c5 = arith.constant 5 : index
    %c0_17 = arith.constant 0 : index
    %16 = vector.load %arg5[%c5, %c0_17] : memref<128x4xf32, #tpu.memory_space<vmem>>, vector<100x4xf32>
    %17 = arith.truncf %16 : vector<100x4xf32> to vector<100x4xbf16>
    %c0_18 = arith.constant 0 : index
    %c0_19 = arith.constant 0 : index
    %18 = vector.load %arg6[%c0_18, %c0_19] : memref<100x36xbf16, #tpu.memory_space<vmem>>, vector<100x4xbf16>
    tpu.vector_store %arg6[%c0_18, %c0_19], %17 {strides = array<i32>} : memref<100x36xbf16, #tpu.memory_space<vmem>>, vector<100x4xbf16>,
    %c6 = arith.constant 6 : index
    %c0_20 = arith.constant 0 : index
    %19 = vector.load %arg5[%c6, %c0_20] : memref<128x4xf32, #tpu.memory_space<vmem>>, vector<100x4xf32>
    %20 = arith.truncf %19 : vector<100x4xf32> to vector<100x4xbf16>
    %c0_21 = arith.constant 0 : index
    %c4 = arith.constant 4 : index
    %21 = vector.load %arg6[%c0_21, %c4] : memref<100x36xbf16, #tpu.memory_space<vmem>>, vector<100x4xbf16>
    tpu.vector_store %arg6[%c0_21, %c4], %20 {strides = array<i32>} : memref<100x36xbf16, #tpu.memory_space<vmem>>, vector<100x4xbf16>,
    %c7 = arith.constant 7 : index
    %c0_22 = arith.constant 0 : index
    %22 = vector.load %arg5[%c7, %c0_22] : memref<128x4xf32, #tpu.memory_space<vmem>>, vector<100x4xf32>
    %23 = arith.truncf %22 : vector<100x4xf32> to vector<100x4xbf16>
    %c0_23 = arith.constant 0 : index
    %c8 = arith.constant 8 : index
    %24 = vector.load %arg6[%c0_23, %c8] : memref<100x36xbf16, #tpu.memory_space<vmem>>, vector<100x4xbf16>
    tpu.vector_store %arg6[%c0_23, %c8], %23 {strides = array<i32>} : memref<100x36xbf16, #tpu.memory_space<vmem>>, vector<100x4xbf16>,
    %c15 = arith.constant 15 : index
    %c0_24 = arith.constant 0 : index
    %25 = vector.load %arg5[%c15, %c0_24] : memref<128x4xf32, #tpu.memory_space<vmem>>, vector<100x4xf32>
    %26 = arith.truncf %25 : vector<100x4xf32> to vector<100x4xbf16>
    %c0_25 = arith.constant 0 : index
    %c12 = arith.constant 12 : index
    %27 = vector.load %arg6[%c0_25, %c12] : memref<100x36xbf16, #tpu.memory_space<vmem>>, vector<100x4xbf16>
    tpu.vector_store %arg6[%c0_25, %c12], %26 {strides = array<i32>} : memref<100x36xbf16, #tpu.memory_space<vmem>>, vector<100x4xbf16>,
    %c16_26 = arith.constant 16 : index
    %c0_27 = arith.constant 0 : index
    %28 = vector.load %arg5[%c16_26, %c0_27] : memref<128x4xf32, #tpu.memory_space<vmem>>, vector<100x4xf32>
    %29 = arith.truncf %28 : vector<100x4xf32> to vector<100x4xbf16>
    %c0_28 = arith.constant 0 : index
    %c16_29 = arith.constant 16 : index
    %30 = vector.load %arg6[%c0_28, %c16_29] : memref<100x36xbf16, #tpu.memory_space<vmem>>, vector<100x4xbf16>
    tpu.vector_store %arg6[%c0_28, %c16_29], %29 {strides = array<i32>} : memref<100x36xbf16, #tpu.memory_space<vmem>>, vector<100x4xbf16>,
    %c17 = arith.constant 17 : index
    %c0_30 = arith.constant 0 : index
    %31 = vector.load %arg5[%c17, %c0_30] : memref<128x4xf32, #tpu.memory_space<vmem>>, vector<100x4xf32>
    %32 = arith.truncf %31 : vector<100x4xf32> to vector<100x4xbf16>
    %c0_31 = arith.constant 0 : index
    %c20 = arith.constant 20 : index
    %33 = vector.load %arg6[%c0_31, %c20] : memref<100x36xbf16, #tpu.memory_space<vmem>>, vector<100x4xbf16>
    tpu.vector_store %arg6[%c0_31, %c20], %32 {strides = array<i32>} : memref<100x36xbf16, #tpu.memory_space<vmem>>, vector<100x4xbf16>,
    %c25 = arith.constant 25 : index
    %c0_32 = arith.constant 0 : index
    %34 = vector.load %arg5[%c25, %c0_32] : memref<128x4xf32, #tpu.memory_space<vmem>>, vector<100x4xf32>
    %35 = arith.truncf %34 : vector<100x4xf32> to vector<100x4xbf16>
    %c0_33 = arith.constant 0 : index
    %c24 = arith.constant 24 : index
    %36 = vector.load %arg6[%c0_33, %c24] : memref<100x36xbf16, #tpu.memory_space<vmem>>, vector<100x4xbf16>
    tpu.vector_store %arg6[%c0_33, %c24], %35 {strides = array<i32>} : memref<100x36xbf16, #tpu.memory_space<vmem>>, vector<100x4xbf16>,
    %c26 = arith.constant 26 : index
    %c0_34 = arith.constant 0 : index
    %37 = vector.load %arg5[%c26, %c0_34] : memref<128x4xf32, #tpu.memory_space<vmem>>, vector<100x4xf32>
    %38 = arith.truncf %37 : vector<100x4xf32> to vector<100x4xbf16>
    %c0_35 = arith.constant 0 : index
    %c28 = arith.constant 28 : index
    %39 = vector.load %arg6[%c0_35, %c28] : memref<100x36xbf16, #tpu.memory_space<vmem>>, vector<100x4xbf16>
    tpu.vector_store %arg6[%c0_35, %c28], %38 {strides = array<i32>} : memref<100x36xbf16, #tpu.memory_space<vmem>>, vector<100x4xbf16>,
    %c27 = arith.constant 27 : index
    %c0_36 = arith.constant 0 : index
    %40 = vector.load %arg5[%c27, %c0_36] : memref<128x4xf32, #tpu.memory_space<vmem>>, vector<100x4xf32>
    %41 = arith.truncf %40 : vector<100x4xf32> to vector<100x4xbf16>
    %c0_37 = arith.constant 0 : index
    %c32 = arith.constant 32 : index
    %42 = vector.load %arg6[%c0_37, %c32] : memref<100x36xbf16, #tpu.memory_space<vmem>>, vector<100x4xbf16>
    tpu.vector_store %arg6[%c0_37, %c32], %41 {strides = array<i32>} : memref<100x36xbf16, #tpu.memory_space<vmem>>, vector<100x4xbf16>,
    %c0_38 = arith.constant 0 : index
    %c0_39 = arith.constant 0 : index
    %43 = vector.load %arg6[%c0_38, %c0_39] : memref<100x36xbf16, #tpu.memory_space<vmem>>, vector<100x36xbf16>
    %c0_40 = arith.constant 0 : index
    %c0_41 = arith.constant 0 : index
    %44 = vector.load %arg2[%c0_40, %c0_41] : memref<36x128xbf16, #tpu.memory_space<vmem>>, vector<36x128xbf16>
    %cst_42 = arith.constant dense<0.000000e+00> : vector<100x128xf32>
    %45 = tpu.matmul %43, %44, %cst_42 {dimension_numbers = #tpu.dot_dimension_numbers<[1], [0], [0], [1], [0, 0, 1, 1], [], []>} : vector<100x36xbf16>, vector<36x128xbf16>, vector<100x128xf32> -> vector<100x128xf32>
    %c0_43 = arith.constant 0 : index
    %c0_44 = arith.constant 0 : index
    %46 = vector.load %arg3[%c0_43, %c0_44] : memref<1x128xf32, #tpu.memory_space<vmem>>, vector<1x128xf32>
    %47 = vector.broadcast %46 : vector<1x128xf32> to vector<100x128xf32>
    %48 = arith.addf %45, %47 : vector<100x128xf32>
    %cst_45 = arith.constant 0.000000e+00 : f32
    %49 = vector.broadcast %cst_45 : f32 to vector<100x128xf32>
    %50 = arith.maximumf %48, %49 : vector<100x128xf32>
    %c0_46 = arith.constant 0 : index
    %c0_47 = arith.constant 0 : index
    %c0_48 = arith.constant 0 : index
    %51 = vector.load %arg4[%c0_46, %c0_47, %c0_48] : memref<1x100x128xf32, #tpu.memory_space<vmem>>, vector<1x100x128xf32>
    %52 = vector.shape_cast %51 : vector<1x100x128xf32> to vector<100x128xf32>
    %53 = vector.shape_cast %50 : vector<100x128xf32> to vector<1x100x128xf32>
    tpu.vector_store %arg4[%c0_46, %c0_47, %c0_48], %53 {strides = array<i32>} : memref<1x100x128xf32, #tpu.memory_space<vmem>>, vector<1x100x128xf32>,
    return
  }
  func.func @transform_0(%arg0: i32) -> (i32, i32, i32, i32) {
    %c0_i32 = arith.constant 0 : i32
    %c0_i32_0 = arith.constant 0 : i32
    %c0_i32_1 = arith.constant 0 : i32
    %c0_i32_2 = arith.constant 0 : i32
    return %arg0, %c0_i32, %c0_i32_0, %c0_i32_1 : i32, i32, i32, i32
  }
  func.func @transform_1(%arg0: i32) -> (i32, i32) {
    %c0_i32 = arith.constant 0 : i32
    %c0_i32_0 = arith.constant 0 : i32
    %c0_i32_1 = arith.constant 0 : i32
    return %c0_i32, %c0_i32_0 : i32, i32
  }
  func.func @transform_2(%arg0: i32) -> (i32, i32) {
    %c0_i32 = arith.constant 0 : i32
    %c0_i32_0 = arith.constant 0 : i32
    %c0_i32_1 = arith.constant 0 : i32
    return %c0_i32, %c0_i32_0 : i32, i32
  }
  func.func @transform_3(%arg0: i32) -> (i32, i32, i32) {
    %c0_i32 = arith.constant 0 : i32
    %c0_i32_0 = arith.constant 0 : i32
    %c0_i32_1 = arith.constant 0 : i32
    return %arg0, %c0_i32, %c0_i32_0 : i32, i32, i32
  }
}

</mosaic_0001>

<bundles_post_ra>
// kernel: tpu_custom_call.1
= control target key start
LH: loop header
LB: loop body
LE: loop exit
PB: predicated region body
PF: predicated region fallthrough
CT: control target
= control target key end

     0   :  { %s1450_s12 = smov 0   ;;  %s1820_s0 = inlined_call_operand.vmem [shape: f32[2,4,100,4], index: 0, kind: input, shape index: {}]   ;;  %s1821_s1 = inlined_call_operand.vmem [shape: bf16[36,128], index: 1, kind: input, shape index: {}]   ;;  %s1822_s2 = inlined_call_operand.vmem [shape: f32[1,128], index: 2, kind: input, shape index: {}]   ;;  %s1823_s3 = inlined_call_operand.vmem [shape: f32[2,100,128], index: 3, kind: output, shape index: {}]  }
   0x1 LB: > { %s1289_s13 = sadd.s32 4294967295, %s1419_s12   ;;  %p1293_p0 = scmp.ge.s32.totalorder %s1419_s12, 1  ;;  %s1419_s12 = sphi %s1450_s12, %s13_s12  }
   0x2   : > { %p137_p1 = scmp.lt.s32.totalorder %s1419_s12, 3 }
   0x4   : > { %p138_p2 = pnand %p1293_p0, %p137_p1 }
   0x5   : > { %p161_p3 = scmp.lt.s32.totalorder (!%p138_p2), %s1289_s13, 1  ;;  %s1422_s18 = smov (!%p138_p2), 4  }
   0x6   : > { %141 = sbr.rel (%p138_p2) target bundleno = 567 (0x237), region = 32  ;;  %s1423_s19 = smov (!%p138_p2), 8  }
   0x7   : > { %s1424_s20 = smov (!%p138_p2), 12   ;;  %s1425_s21 = smov (!%p138_p2), 16  }
   0x8   : > { %s1426_s22 = smov (!%p138_p2), 20   ;;  %s1427_s23 = smov (!%p138_p2), 24  }
   0x9   : > { %s1428_s24 = smov (!%p138_p2), 28   ;;  %s1429_s25 = smov (!%p138_p2), 32  }
   0xb   : > { %vm266_vm0 = vcmask 31744   ;;  %v1421_v0 = vmov 0.0   ;;  %s1825_s13 = smov (!%p161_p3, %s1289_s13), 1  ;;  %vm281_vm1 = vcmask 27648   ;;  %vm403_vm2 = vcmask 60448  }
   0xc   : > { %267 = vst.msk [vmem:[#allocation2] sm:$0xff] %vm266_vm0, %v1421_v0  ;;  %s1393_s14 = smul.u32 416, %s1825_s13  ;;  %vm323_vm3 = vcmask 25600   ;;  %vm496_vm4 = vcmask 93248   ;;  %vm416_vm5 = vcmask 58400   ;;  %vm589_vm6 = vcmask 126048  }
   0xd   : > { %268 = vst.msk [vmem:[#allocation2 + $0x8] sm:$0xff] %vm266_vm0, %v1421_v0  ;;  %vm509_vm7 = vcmask 91200   ;;  %vm682_vm8 = vcmask 158848   ;;  %vm775_vm9 = vcmask 191648   ;;  %vm868_vm10 = vcmask 224448   ;;  %s1394_s7 = smul.u32 104, %s1825_s13 }
   0xe   : > { %283 = vst.msk [vmem:[#allocation2 + $0x74] sm:$0xff] %vm266_vm0, %v1421_v0  ;;  %s1470_s17 = scalar_lea.vmem %s1820_s0, %s1393_s14  ;;  %vm1161_vm11 = vcmask 1041408   ;;  %vm961_vm12 = vcmask 257248   ;;  %vm1054_vm13 = vcmask 290048   ;;  %vm1139_vm14 = vcmask 293888  }
   0xf   : > { %v172_v1 = vld [vmem:[%s1470_s17] sm:$0xff]  ;;  %v173_v2 = vld [vmem:[%s1470_s17 + $0x8] sm:$0xff]  ;;  %v1297_v4 = vld [vmem:[%s1470_s17 + $0x70] sm:$0xff]  ;;  %284 = vst.msk [vmem:[#allocation2 + $0x7c] sm:$0xf] %vm281_vm1, %v1421_v0  ;;  %vm602_vm15 = vcmask 124000   ;;  %s1802_s10 = scalar_lea.vmem %s1823_s3, %s1394_s7 }
  0x10   : > { %v1296_v3 = vld [vmem:[%s1470_s17 + $0x68] sm:$0xff]  ;;  %v1309_v6 = vld [vmem:[%s1470_s17 + $0xd0] sm:$0xff]  ;;  %v1310_v7 = vld [vmem:[%s1470_s17 + $0xd8] sm:$0xff]  ;;  %v200_v9 = vmax.f32 %v173_v2, %v1297_v4 }
  0x11   : > { %v199_v5 = vmax.f32 %v172_v1, %v1296_v3  ;;  %v1322_v10 = vld [vmem:[%s1470_s17 + $0x138] sm:$0xff]  ;;  %v1323_v11 = vld [vmem:[%s1470_s17 + $0x140] sm:$0xff]  ;;  %v174_v15 = vld [vmem:[%s1470_s17 + $0x10] sm:$0xff] }
  0x12   : > { %v240_v13 = vmax.f32 %v1309_v6, %v1322_v10  ;;  %v241_v14 = vmax.f32 %v1310_v7, %v1323_v11  ;;  %v1298_v16 = vld [vmem:[%s1470_s17 + $0x78] sm:$0xff]  ;;  %v1311_v17 = vld [vmem:[%s1470_s17 + $0xe0] sm:$0xff]  ;;  %v1324_v19 = vld [vmem:[%s1470_s17 + $0x148] sm:$0xff] }
  0x13   : > { %v201_v18 = vmax.f32 %v174_v15, %v1298_v16  ;;  %v176_v20 = vld [vmem:[%s1470_s17 + $0x20] sm:$0xff]  ;;  %v177_v21 = vld [vmem:[%s1470_s17 + $0x28] sm:$0xff]  ;;  %v242_v24 = vmax.f32 %v1311_v17, %v1324_v19  ;;  %v1301_v26 = vld [vmem:[%s1470_s17 + $0x90] sm:$0xff] }
  0x14   : > { %v325_v8 = vld [vmem:[#allocation2 + $0x6] sm:$0xff]  ;;  %v253_v22 = vmax.f32 %v199_v5, %v240_v13  ;;  %v254_v23 = vmax.f32 %v200_v9, %v241_v14  ;;  %v1313_v27 = vld [vmem:[%s1470_s17 + $0xf0] sm:$0xff]  ;;  %v204_v29 = vmax.f32 %v177_v21, %v1301_v26  ;;  %v1314_v30 = vld [vmem:[%s1470_s17 + $0xf8] sm:$0xff] }
  0x15   : > { %v338_v12 = vpack.c.bf16 %v325_v8, %v325_v8  ;;  %v1300_v25 = vld [vmem:[%s1470_s17 + $0x88] sm:$0xff]  ;;  %v1326_v31 = vld [vmem:[%s1470_s17 + $0x158] sm:$0xff]  ;;  %v1327_v32 = vld [vmem:[%s1470_s17 + $0x160] sm:$0xff]  ;;  %v255_v33 = vmax.f32 %v201_v18, %v242_v24 }
  0x16   : > { %v203_v28 = vmax.f32 %v176_v20, %v1300_v25  ;;  %269 = vst.msk [vmem:[#allocation2 + $0x10] sm:$0xff] %vm266_vm0, %v253_v22  ;;  %v244_v34 = vmax.f32 %v1313_v27, %v1326_v31  ;;  %v245_v35 = vmax.f32 %v1314_v30, %v1327_v32  ;;  %v178_v36 = vld [vmem:[%s1470_s17 + $0x30] sm:$0xff]  ;;  %v1302_v37 = vld [vmem:[%s1470_s17 + $0x98] sm:$0xff]  ;;  %v1315_v38 = vld [vmem:[%s1470_s17 + $0x100] sm:$0xff] }
  0x17   : > { %364 = vrot.lane.b32.xlu0 %v338_v12, %s1422_s18  ;;  %270 = vst.msk [vmem:[#allocation2 + $0x18] sm:$0xff] %vm266_vm0, %v254_v23  ;;  %v205_v39 = vmax.f32 %v178_v36, %v1302_v37  ;;  %v1328_v40 = vld [vmem:[%s1470_s17 + $0x168] sm:$0xff]  ;;  %v179_v41 = vld [vmem:[%s1470_s17 + $0x38] sm:$0xff]  ;;  %v180_v42 = vld [vmem:[%s1470_s17 + $0x40] sm:$0xff] }
  0x18   : > { %271 = vst.msk [vmem:[#allocation2 + $0x20] sm:$0xff] %vm266_vm0, %v255_v33  ;;  %v257_v43 = vmax.f32 %v203_v28, %v244_v34  ;;  %v258_v44 = vmax.f32 %v204_v29, %v245_v35  ;;  %v246_v45 = vmax.f32 %v1315_v38, %v1328_v40  ;;  %v1303_v46 = vld [vmem:[%s1470_s17 + $0xa0] sm:$0xff]  ;;  %v1304_v47 = vld [vmem:[%s1470_s17 + $0xa8] sm:$0xff]  ;;  %v1317_v51 = vld [vmem:[%s1470_s17 + $0x110] sm:$0xff] }
  0x19   : > { %v1316_v48 = vld [vmem:[%s1470_s17 + $0x108] sm:$0xff]  ;;  %v206_v49 = vmax.f32 %v179_v41, %v1303_v46  ;;  %v207_v50 = vmax.f32 %v180_v42, %v1304_v47  ;;  %v1329_v52 = vld [vmem:[%s1470_s17 + $0x170] sm:$0xff]  ;;  %v1330_v53 = vld [vmem:[%s1470_s17 + $0x178] sm:$0xff] }
  0x1a   : > { %273 = vst.msk [vmem:[#allocation2 + $0x30] sm:$0xff] %vm266_vm0, %v257_v43  ;;  %v259_v54 = vmax.f32 %v205_v39, %v246_v45  ;;  %v247_v55 = vmax.f32 %v1316_v48, %v1329_v52  ;;  %v248_v56 = vmax.f32 %v1317_v51, %v1330_v53  ;;  %v175_v57 = vld [vmem:[%s1470_s17 + $0x18] sm:$0xff]  ;;  %v1299_v58 = vld [vmem:[%s1470_s17 + $0x80] sm:$0xff]  ;;  %v1312_v59 = vld [vmem:[%s1470_s17 + $0xe8] sm:$0xff] }
  0x1b   : > { %274 = vst.msk [vmem:[#allocation2 + $0x38] sm:$0xff] %vm266_vm0, %v258_v44  ;;  %v202_v60 = vmax.f32 %v175_v57, %v1299_v58  ;;  %v1325_v61 = vld [vmem:[%s1470_s17 + $0x150] sm:$0xff]  ;;  %v181_v62 = vld [vmem:[%s1470_s17 + $0x48] sm:$0xff]  ;;  %v1318_v5 = vld [vmem:[%s1470_s17 + $0x118] sm:$0xff] }
  0x1c   : > { %v1305_v63 = vld [vmem:[%s1470_s17 + $0xb0] sm:$0xff]  ;;  %275 = vst.msk [vmem:[#allocation2 + $0x40] sm:$0xff] %vm266_vm0, %v259_v54  ;;  %v260_v1 = vmax.f32 %v206_v49, %v247_v55  ;;  %v261_v2 = vmax.f32 %v207_v50, %v248_v56  ;;  %v243_v3 = vmax.f32 %v1312_v59, %v1325_v61  ;;  %v1331_v6 = vld [vmem:[%s1470_s17 + $0x180] sm:$0xff]  ;;  %v183_v10 = vld [vmem:[%s1470_s17 + $0x58] sm:$0xff] }
  0x1d   : > { %v208_v4 = vmax.f32 %v181_v62, %v1305_v63  ;;  %v182_v7 = vld [vmem:[%s1470_s17 + $0x50] sm:$0xff]  ;;  %v249_v9 = vmax.f32 %v1318_v5, %v1331_v6  ;;  %v1306_v11 = vld [vmem:[%s1470_s17 + $0xb8] sm:$0xff]  ;;  %v1307_v15 = vld [vmem:[%s1470_s17 + $0xc0] sm:$0xff] }
  0x1e   : > { %v326_v8 = vld [vmem:[#allocation2 + $0xe] sm:$0xff]  ;;  %v327_v12 = vld [vmem:[#allocation2 + $0x16] sm:$0xff]  ;;  %276 = vst.msk [vmem:[#allocation2 + $0x48] sm:$0xff] %vm266_vm0, %v260_v1  ;;  %v256_v14 = vmax.f32 %v202_v60, %v243_v3  ;;  %v209_v16 = vmax.f32 %v182_v7, %v1306_v11  ;;  %v1319_v17 = vld [vmem:[%s1470_s17 + $0x120] sm:$0xff]  ;;  %v210_v20 = vmax.f32 %v183_v10, %v1307_v15 }
  0x1f   : > { %v339_v13 = vpack.c.bf16 %v326_v8, %v326_v8  ;;  %v340_v18 = vpack.c.bf16 %v327_v12, %v327_v12  ;;  %277 = vst.msk [vmem:[#allocation2 + $0x50] sm:$0xff] %vm266_vm0, %v261_v2  ;;  %v262_v19 = vmax.f32 %v208_v4, %v249_v9  ;;  %v1320_v21 = vld [vmem:[%s1470_s17 + $0x128] sm:$0xff]  ;;  %v1333_v23 = vld [vmem:[%s1470_s17 + $0x190] sm:$0xff]  ;;  %v328_v26 = vld [vmem:[#allocation2 + $0x1e] sm:$0xff] }
  0x20   : > { %v1332_v22 = vld [vmem:[%s1470_s17 + $0x188] sm:$0xff]  ;;  %272 = vst.msk [vmem:[#allocation2 + $0x28] sm:$0xff] %vm266_vm0, %v256_v14  ;;  %v251_v25 = vmax.f32 %v1320_v21, %v1333_v23  ;;  %v341_v31 = vpack.c.bf16 %v328_v26, %v328_v26  ;;  %v420_v46 = vld [vmem:[#allocation2 + $0x17] sm:$0xff]  ;;  %v421_v53 = vld [vmem:[#allocation2 + $0x1f] sm:$0xff] }
  0x21   : > { %366 = vrot.lane.b32.xlu0 %v339_v13, %s1422_s18  ;;  %v250_v24 = vmax.f32 %v1319_v17, %v1332_v22  ;;  %368 = vrot.lane.b32.xlu1 %v340_v18, %s1422_s18  ;;  %278 = vst.msk [vmem:[#allocation2 + $0x58] sm:$0xff] %vm266_vm0, %v262_v19  ;;  %v418_v47 = vld [vmem:[#allocation2 + $0x7] sm:$0xff]  ;;  %v433_v49 = vpack.c.bf16 %v420_v46, %v420_v46  ;;  %v419_v54 = vld [vmem:[#allocation2 + $0xf] sm:$0xff]  ;;  %v184_v18 = vld [vmem:[%s1470_s17 + $0x60] sm:$0xf] }
  0x22   : > { %v331_v27 = vld [vmem:[#allocation2 + $0x36] sm:$0xff]  ;;  %v264_v29 = vmax.f32 %v210_v20, %v251_v25  ;;  %v431_v50 = vpack.c.bf16 %v418_v47, %v418_v47  ;;  %v434_v56 = vpack.c.bf16 %v421_v53, %v421_v53  ;;  %v432_v57 = vpack.c.bf16 %v419_v54, %v419_v54  ;;  %v285_v11 = vld [vmem:[#allocation2 + $0x5] sm:$0xff]  ;;  %v1321_v20 = vld [vmem:[%s1470_s17 + $0x130] sm:$0xf] }
  0x23   : > { %v263_v28 = vmax.f32 %v209_v16, %v250_v24  ;;  %v344_v30 = vpack.c.bf16 %v331_v27, %v331_v27  ;;  %v332_v35 = vld [vmem:[#allocation2 + $0x3e] sm:$0xff]  ;;  %v298_v12 = vpack.c.bf16 %v285_v11, %v285_v11  ;;  %v287_v13 = vld [vmem:[#allocation2 + $0x15] sm:$0xff]  ;;  %v1308_v19 = vld [vmem:[%s1470_s17 + $0xc8] sm:$0xf] }
  0x24   : > { %280 = vst.msk [vmem:[#allocation2 + $0x68] sm:$0xff] %vm266_vm0, %v264_v29  ;;  %v345_v38 = vpack.c.bf16 %v332_v35, %v332_v35  ;;  %v424_v59 = vld [vmem:[#allocation2 + $0x37] sm:$0xff]  ;;  %v425_v3 = vld [vmem:[#allocation2 + $0x3f] sm:$0xff]  ;;  %v300_v16 = vpack.c.bf16 %v287_v13, %v287_v13  ;;  %v211_v21 = vmax.f32 %v184_v18, %v1308_v19  ;;  %v286_v23 = vld [vmem:[#allocation2 + $0xd] sm:$0xff] }
  0x25   : > { %279 = vst.msk [vmem:[#allocation2 + $0x60] sm:$0xff] %vm266_vm0, %v263_v28  ;;  %v333_v42 = vld [vmem:[#allocation2 + $0x46] sm:$0xff]  ;;  %v437_v62 = vpack.c.bf16 %v424_v59, %v424_v59  ;;  %v438_v6 = vpack.c.bf16 %v425_v3, %v425_v3  ;;  %v1334_v0 = vld [vmem:[%s1470_s17 + $0x198] sm:$0xf]  ;;  %v299_v25 = vpack.c.bf16 %v286_v23, %v286_v23  ;;  %v288_v27 = vld [vmem:[#allocation2 + $0x1d] sm:$0xff]  ;;  %vm695_vm0 = vcmask 156800  }
  0x26   : > { %v334_v34 = vld [vmem:[#allocation2 + $0x4e] sm:$0xff]  ;;  %v346_v45 = vpack.c.bf16 %v333_v42, %v333_v42  ;;  %311 = vst.msk [vmem:[#allocation3] sm:$0xf] %vm281_vm1, %v298_v12  ;;  %v252_v24 = vmax.f32 %v1321_v20, %v1334_v0  ;;  %v698_v3 = vld [vmem:[#allocation2 + $0x19] sm:$0xff] }
  0x27   : > { %v329_v32 = vld [vmem:[#allocation2 + $0x26] sm:$0xff]  ;;  %v330_v36 = vld [vmem:[#allocation2 + $0x2e] sm:$0xff]  ;;  %v347_v37 = vpack.c.bf16 %v334_v34, %v334_v34  ;;  %313 = vst.msk [vmem:[#allocation3 + $0x8] sm:$0xf] %vm281_vm1, %v300_v16 }
  0x28   : > { %v342_v33 = vpack.c.bf16 %v329_v32, %v329_v32  ;;  %v343_v39 = vpack.c.bf16 %v330_v36, %v330_v36  ;;  %v335_v41 = vld [vmem:[#allocation2 + $0x56] sm:$0xff]  ;;  %v426_v58 = vld [vmem:[#allocation2 + $0x47] sm:$0xff]  ;;  %v265_v26 = vmax.f32 %v211_v21, %v252_v24  ;;  %312 = vst.msk [vmem:[#allocation3 + $0x4] sm:$0xf] %vm281_vm1, %v299_v25 }
  0x29   : > { %376 = vrot.lane.b32.xlu0 %v344_v30, %s1422_s18  ;;  %370 = vrot.lane.b32.xlu1 %v341_v31, %s1422_s18  ;;  %v348_v44 = vpack.c.bf16 %v335_v41, %v335_v41  ;;  %v423_v52 = vld [vmem:[#allocation2 + $0x2f] sm:$0xff]  ;;  %v422_v60 = vld [vmem:[#allocation2 + $0x27] sm:$0xff]  ;;  %v439_v61 = vpack.c.bf16 %v426_v58, %v426_v58  ;;  %v428_v8 = vld [vmem:[#allocation2 + $0x57] sm:$0xff]  ;;  %v301_v30 = vpack.c.bf16 %v288_v27, %v288_v27 }
  0x2a   : > { %372 = vrot.lane.b32.xlu2 %v342_v33, %s1422_s18  ;;  %v436_v55 = vpack.c.bf16 %v423_v52, %v423_v52  ;;  %v435_v63 = vpack.c.bf16 %v422_v60, %v422_v60  ;;  %v427_v2 = vld [vmem:[#allocation2 + $0x4f] sm:$0xff]  ;;  %v1559_v10 = vpack.c.bf16 %v428_v8, %v428_v8  ;;  %v289_v15 = vld [vmem:[#allocation2 + $0x25] sm:$0xff]  ;;  %282 = vst.msk [vmem:[#allocation2 + $0x70] sm:$0xf] %vm281_vm1, %v265_v26  ;;  %v605_v41 = vld [vmem:[#allocation2 + $0x18] sm:$0xff] }
  0x2b   : > { %v440_v5 = vpack.c.bf16 %v427_v2, %v427_v2  ;;  %v302_v17 = vpack.c.bf16 %v289_v15, %v289_v15  ;;  %v604_v28 = vld [vmem:[#allocation2 + $0x10] sm:$0xff]  ;;  %314 = vst.msk [vmem:[#allocation3 + $0xc] sm:$0xf] %vm281_vm1, %v301_v30  ;;  %v618_v47 = vpack.c.bf16 %v605_v41, %v605_v41  ;;  %v795_v16 = vld [vmem:[#allocation2 + $0x41] sm:$0xff] }
  0x2c   : > { %v337_v40 = vld [vmem:[#allocation2 + $0x66] sm:$0xf]  ;;  %v336_v48 = vld [vmem:[#allocation2 + $0x5e] sm:$0xff]  ;;  %v290_v29 = vld [vmem:[#allocation2 + $0x2d] sm:$0xff]  ;;  %v617_v33 = vpack.c.bf16 %v604_v28, %v604_v28  ;;  %v1626_v21 = vpack.c.bf16 %v795_v16, %v795_v16 }
  0x2d   : > { %v350_v43 = vpack.c.bf16 %v337_v40, %v337_v40  ;;  %v349_v51 = vpack.c.bf16 %v336_v48, %v336_v48  ;;  %v429_v1 = vld [vmem:[#allocation2 + $0x5f] sm:$0xff]  ;;  %v430_v7 = vld [vmem:[#allocation2 + $0x67] sm:$0xf]  ;;  %315 = vst.msk [vmem:[#allocation3 + $0x10] sm:$0xf] %vm281_vm1, %v302_v17  ;;  %v303_v32 = vpack.c.bf16 %v290_v29, %v290_v29  ;;  %v291_v34 = vld [vmem:[#allocation2 + $0x35] sm:$0xff] }
  0x2e   : > { %v1553_v4 = vpack.c.bf16 %v429_v1, %v429_v1  ;;  %v443_v9 = vpack.c.bf16 %v430_v7, %v430_v7  ;;  %v522_v14 = vld [vmem:[#allocation2 + $0x67] sm:$0xff]  ;;  %v304_v36 = vpack.c.bf16 %v291_v34, %v291_v34  ;;  %v697_v52 = vld [vmem:[#allocation2 + $0x11] sm:$0xff]  ;;  %v296_v53 = vld [vmem:[#allocation2 + $0x5d] sm:$0xff]  ;;  %v711_v7 = vpack.c.bf16 %v698_v3, %v698_v3 }
  0x2f   : > { %v535_v22 = vpack.c.bf16 %v522_v14, %v522_v14  ;;  %v614_v31 = vld [vmem:[#allocation2 + $0x60] sm:$0xff]  ;;  %316 = vst.msk [vmem:[#allocation3 + $0x14] sm:$0xf] %vm281_vm1, %v303_v32  ;;  %v294_v46 = vld [vmem:[#allocation2 + $0x4d] sm:$0xff]  ;;  %v710_v58 = vpack.c.bf16 %v697_v52, %v697_v52 }
  0x30   : > { %v627_v35 = vpack.c.bf16 %v614_v31, %v614_v31  ;;  %317 = vst.msk [vmem:[#allocation3 + $0x18] sm:$0xf] %vm281_vm1, %v304_v36  ;;  %v307_v48 = vpack.c.bf16 %v294_v46, %v294_v46  ;;  %v297_v60 = vld [vmem:[#allocation2 + $0x65] sm:$0xf]  ;;  %v702_v1 = vld [vmem:[#allocation2 + $0x39] sm:$0xff]  ;;  %v701_v13 = vld [vmem:[#allocation2 + $0x31] sm:$0xff] }
  0x31   : > { %382 = vrot.lane.b32.xlu0 %v347_v37, %s1422_s18  ;;  %378 = vrot.lane.b32.xlu1 %v345_v38, %s1422_s18  ;;  %v292_v37 = vld [vmem:[#allocation2 + $0x3d] sm:$0xff]  ;;  %v800_v8 = vld [vmem:[#allocation2 + $0x69] sm:$0xff]  ;;  %v1618_v15 = vpack.c.bf16 %v701_v13, %v701_v13  ;;  %v801_v20 = vld [vmem:[#allocation2 + $0x71] sm:$0xff] }
  0x32   : > { %374 = vrot.lane.b32.xlu2 %v343_v39, %s1422_s18  ;;  %v609_v38 = vld [vmem:[#allocation2 + $0x38] sm:$0xff]  ;;  %v293_v39 = vld [vmem:[#allocation2 + $0x45] sm:$0xff]  ;;  %v305_v40 = vpack.c.bf16 %v292_v37, %v292_v37  ;;  %320 = vst.msk [vmem:[#allocation3 + $0x24] sm:$0xf] %vm281_vm1, %v307_v48  ;;  %v814_v23 = vpack.c.bf16 %v801_v20, %v801_v20  ;;  %v523_v3 = vld [vmem:[#allocation2 + $0x6f] sm:$0xf] }
  0x33   : > { %v306_v42 = vpack.c.bf16 %v293_v39, %v293_v39  ;;  %v791_v18 = vld [vmem:[#allocation2 + $0x21] sm:$0xff]  ;;  %v893_v26 = vld [vmem:[#allocation2 + $0x6a] sm:$0xff] }
  0x34   : > { %318 = vst.msk [vmem:[#allocation3 + $0x1c] sm:$0xf] %vm281_vm1, %v305_v40  ;;  %v883_v24 = vld [vmem:[#allocation2 + $0x1a] sm:$0xff]  ;;  %v906_v30 = vpack.c.bf16 %v893_v26, %v893_v26  ;;  %v888_v31 = vld [vmem:[#allocation2 + $0x42] sm:$0xff]  ;;  %v709_v20 = vld [vmem:[#allocation2 + $0x71] sm:$0xf] }
  0x35   : > { %319 = vst.msk [vmem:[#allocation3 + $0x20] sm:$0xf] %vm281_vm1, %v306_v42  ;;  %v896_v28 = vpack.c.bf16 %v883_v24, %v883_v24  ;;  %v901_v36 = vpack.c.bf16 %v888_v31, %v888_v31  ;;  %v976_v40 = vld [vmem:[#allocation2 + $0x1b] sm:$0xff]  ;;  %v986_v42 = vld [vmem:[#allocation2 + $0x6b] sm:$0xff] }
  0x39   : > { %388 = vrot.lane.b32.xlu0 %v350_v43, %s1422_s18  ;;  %384 = vrot.lane.b32.xlu1 %v348_v44, %s1422_s18  ;;  %v615_v43 = vld [vmem:[#allocation2 + $0x68] sm:$0xff]  ;;  %v622_v44 = vpack.c.bf16 %v609_v38, %v609_v38 }
  0x3a   : > { %380 = vrot.lane.b32.xlu2 %v346_v45, %s1422_s18 }
  0x41   : > { %461 = vrot.lane.b32.xlu0 %v433_v49, %s1423_s19  ;;  %457 = vrot.lane.b32.xlu1 %v431_v50, %s1423_s19  ;;  %v628_v50 = vpack.c.bf16 %v615_v43, %v615_v43 }
  0x42   : > { %386 = vrot.lane.b32.xlu2 %v349_v51, %s1422_s18  ;;  %v295_v51 = vld [vmem:[#allocation2 + $0x55] sm:$0xff] }
  0x43   : > { %v308_v54 = vpack.c.bf16 %v295_v51, %v295_v51  ;;  %v977_v51 = vld [vmem:[#allocation2 + $0x23] sm:$0xff] }
  0x45   : > { %321 = vst.msk [vmem:[#allocation3 + $0x28] sm:$0xf] %vm281_vm1, %v308_v54 }
  0x49   : > { %467 = vrot.lane.b32.xlu0 %v436_v55, %s1423_s19  ;;  %463 = vrot.lane.b32.xlu1 %v434_v56, %s1423_s19 }
  0x4a   : > { %459 = vrot.lane.b32.xlu2 %v432_v57, %s1423_s19 }
  0x51   : > { %473 = vrot.lane.b32.xlu0 %v439_v61, %s1423_s19  ;;  %469 = vrot.lane.b32.xlu1 %v437_v62, %s1423_s19 }
  0x52   : > { %465 = vrot.lane.b32.xlu2 %v435_v63, %s1423_s19 }
  0x59   : > { %479 = vrot.lane.b32.xlu0 %v1553_v4, %s1423_s19  ;;  %475 = vrot.lane.b32.xlu1 %v440_v5, %s1423_s19 }
  0x5a   : > { %471 = vrot.lane.b32.xlu2 %v438_v6, %s1423_s19 }
  0x61   : > { %552 = vrot.lane.b32.xlu0 %v433_v49, %s1424_s20  ;;  %481 = vrot.lane.b32.xlu1 %v443_v9, %s1423_s19  ;;  %v813_v9 = vpack.c.bf16 %v800_v8, %v800_v8  ;;  %v536_v8 = vpack.c.bf16 %v523_v3, %v523_v3 }
  0x62   : > { %477 = vrot.lane.b32.xlu2 %v1559_v10, %s1423_s19 }
  0x69   : > { %558 = vrot.lane.b32.xlu0 %v436_v55, %s1424_s20  ;;  %554 = vrot.lane.b32.xlu1 %v434_v56, %s1424_s20  ;;  %v707_v55 = vld [vmem:[#allocation2 + $0x61] sm:$0xff]  ;;  %v309_v56 = vpack.c.bf16 %v296_v53, %v296_v53  ;;  %v987_v53 = vld [vmem:[#allocation2 + $0x73] sm:$0xff] }
  0x6a   : > { %550 = vrot.lane.b32.xlu2 %v432_v57, %s1424_s20  ;;  %v608_v57 = vld [vmem:[#allocation2 + $0x30] sm:$0xff] }
  0x6b   : > { %322 = vst.msk [vmem:[#allocation3 + $0x2c] sm:$0xf] %vm281_vm1, %v309_v56  ;;  %v990_v56 = vpack.c.bf16 %v977_v51, %v977_v51  ;;  %vm788_vm1 = vcmask 189600  }
  0x71   : > { %564 = vrot.lane.b32.xlu0 %v439_v61, %s1424_s20  ;;  %560 = vrot.lane.b32.xlu1 %v437_v62, %s1424_s20  ;;  %v1602_v61 = vpack.c.bf16 %v707_v55, %v707_v55  ;;  %v310_v62 = vpack.c.bf16 %v297_v60, %v297_v60 }
  0x72   : > { %556 = vrot.lane.b32.xlu2 %v435_v63, %s1424_s20  ;;  %v621_v63 = vpack.c.bf16 %v608_v57, %v608_v57  ;;  %v1000_v57 = vpack.c.bf16 %v987_v53, %v987_v53 }
  0x73   : > { %324 = vst.msk [vmem:[#allocation3 + $0x30] sm:$0x3] %vm323_vm3, %v310_v62  ;;  %v980_v62 = vld [vmem:[#allocation2 + $0x3b] sm:$0xff]  ;;  %vm974_vm3 = vcmask 255200  }
  0x79   : > { %572 = vrot.lane.b32.xlu0 %v535_v22, %s1424_s20  ;;  %566 = vrot.lane.b32.xlu1 %v440_v5, %s1424_s20  ;;  %v715_v5 = vpack.c.bf16 %v702_v1, %v702_v1  ;;  %v1628_v22 = vpack.c.bf16 %v791_v18, %v791_v18 }
  0x7a   : > { %562 = vrot.lane.b32.xlu2 %v438_v6, %s1424_s20 }
  0x81   : > { %643 = vrot.lane.b32.xlu0 %v617_v33, %s1425_s21  ;;  %663 = vrot.lane.b32.xlu1 %v627_v35, %s1425_s21  ;;  %v884_v33 = vld [vmem:[#allocation2 + $0x22] sm:$0xff]  ;;  %v894_v35 = vld [vmem:[#allocation2 + $0x72] sm:$0xff] }
  0x82   : > { %570 = vrot.lane.b32.xlu2 %v1553_v4, %s1424_s20  ;;  %v897_v38 = vpack.c.bf16 %v884_v33, %v884_v33  ;;  %v907_v39 = vpack.c.bf16 %v894_v35, %v894_v35 }
  0x84   : > { %v373_v45 = vpop.permute.xlu2 %372 }
  0x85   : > { %408 = vst.msk [vmem:[#allocation3 + $0x10] sm:$0xf] %vm403_vm2, %v373_v45  ;;  %v989_v45 = vpack.c.bf16 %v976_v40, %v976_v40  ;;  %v985_v40 = vld [vmem:[#allocation2 + $0x63] sm:$0xff] }
  0x89   : > { %v365_v49 = vpop.permute.xlu0 %364  ;;  %653 = vrot.lane.b32.xlu0 %v622_v44, %s1425_s21  ;;  %645 = vrot.lane.b32.xlu1 %v618_v47, %s1425_s21  ;;  %v887_v44 = vld [vmem:[#allocation2 + $0x3a] sm:$0xff]  ;;  %v999_v47 = vpack.c.bf16 %v986_v42, %v986_v42 }
  0x8a   : > { %404 = vst.msk [vmem:[#allocation3] sm:$0xf] %vm403_vm2, %v365_v49  ;;  %665 = vrot.lane.b32.xlu2 %v628_v50, %s1425_s21  ;;  %v900_v48 = vpack.c.bf16 %v887_v44, %v887_v44  ;;  %v981_v49 = vld [vmem:[#allocation2 + $0x43] sm:$0xff]  ;;  %v998_v44 = vpack.c.bf16 %v985_v40, %v985_v40 }
  0x8b   : > { %v994_v54 = vpack.c.bf16 %v981_v49, %v981_v49 }
  0x8c   : > { %v375_v59 = vpop.permute.xlu2 %374 }
  0x8d   : > { %409 = vst.msk [vmem:[#allocation3 + $0x14] sm:$0xf] %vm403_vm2, %v375_v59 }
  0x91   : > { %736 = vrot.lane.b32.xlu0 %v710_v58, %s1426_s22  ;;  %756 = vrot.lane.b32.xlu1 %v1602_v61, %s1426_s22  ;;  %v613_v58 = vld [vmem:[#allocation2 + $0x58] sm:$0xff] }
  0x92   : > { %651 = vrot.lane.b32.xlu2 %v621_v63, %s1425_s21  ;;  %v626_v63 = vpack.c.bf16 %v613_v58, %v613_v58 }
  0x93   : > { %v367_v2 = vpop.permute.xlu0 %366  ;;  %v369_v4 = vpop.permute.xlu1 %368 }
  0x94   : > { %405 = vst.msk [vmem:[#allocation3 + $0x4] sm:$0xf] %vm403_vm2, %v367_v2  ;;  %v381_v6 = vpop.permute.xlu2 %380  ;;  %v993_v2 = vpack.c.bf16 %v980_v62, %v980_v62  ;;  %v988_v62 = vld [vmem:[#allocation2 + $0x7b] sm:$0xf] }
  0x95   : > { %406 = vst.msk [vmem:[#allocation3 + $0x8] sm:$0xf] %vm403_vm2, %v369_v4  ;;  %v1001_v3 = vpack.c.bf16 %v988_v62, %v988_v62 }
  0x96   : > { %412 = vst.msk [vmem:[#allocation3 + $0x20] sm:$0xf] %vm403_vm2, %v381_v6 }
  0x99   : > { %746 = vrot.lane.b32.xlu0 %v715_v5, %s1426_s22  ;;  %738 = vrot.lane.b32.xlu1 %v711_v7, %s1426_s22 }
  0x9a   : > { %758 = vrot.lane.b32.xlu2 %v813_v9, %s1426_s22 }
  0x9b   : > { %v377_v11 = vpop.permute.xlu0 %376  ;;  %v371_v12 = vpop.permute.xlu1 %370 }
  0x9c   : > { %410 = vst.msk [vmem:[#allocation3 + $0x18] sm:$0xf] %vm403_vm2, %v377_v11  ;;  %v387_v14 = vpop.permute.xlu2 %386 }
  0x9d   : > { %407 = vst.msk [vmem:[#allocation3 + $0xc] sm:$0xf] %vm403_vm2, %v371_v12 }
  0x9e   : > { %415 = vst.msk [vmem:[#allocation3 + $0x2c] sm:$0xf] %vm403_vm2, %v387_v14  ;;  %v798_v14 = vld [vmem:[#allocation2 + $0x59] sm:$0xff] }
  0xa1   : > { %829 = vrot.lane.b32.xlu0 %v711_v7, %s1427_s23  ;;  %849 = vrot.lane.b32.xlu1 %v813_v9, %s1427_s23  ;;  %v612_v7 = vld [vmem:[#allocation2 + $0x50] sm:$0xff] }
  0xa2   : > { %744 = vrot.lane.b32.xlu2 %v1618_v15, %s1426_s22  ;;  %v625_v12 = vpack.c.bf16 %v612_v7, %v612_v7 }
  0xa3   : > { %v383_v17 = vpop.permute.xlu0 %382  ;;  %v379_v19 = vpop.permute.xlu1 %378 }
  0xa4   : > { %413 = vst.msk [vmem:[#allocation3 + $0x24] sm:$0xf] %vm403_vm2, %v383_v17  ;;  %v460_v0 = vpop.permute.xlu2 %459 }
  0xa5   : > { %411 = vst.msk [vmem:[#allocation3 + $0x1c] sm:$0xf] %vm403_vm2, %v379_v19  ;;  %v811_v19 = vpack.c.bf16 %v798_v14, %v798_v14 }
  0xa6   : > { %498 = vst.msk [vmem:[#allocation3 + $0x4] sm:$0xf] %vm496_vm4, %v460_v0 }
  0xa9   : > { %839 = vrot.lane.b32.xlu0 %v1626_v21, %s1427_s23  ;;  %831 = vrot.lane.b32.xlu1 %v1628_v22, %s1427_s23 }
  0xaa   : > { %851 = vrot.lane.b32.xlu2 %v814_v23, %s1427_s23  ;;  %v891_v23 = vld [vmem:[#allocation2 + $0x5a] sm:$0xff] }
  0xab   : > { %v389_v25 = vpop.permute.xlu0 %388  ;;  %v385_v27 = vpop.permute.xlu1 %384 }
  0xac   : > { %417 = vst.msk [vmem:[#allocation3 + $0x30] sm:$0x3] %vm416_vm5, %v389_v25  ;;  %v466_v29 = vpop.permute.xlu2 %465  ;;  %v722_v25 = vpack.c.bf16 %v709_v20, %v709_v20 }
  0xad   : > { %414 = vst.msk [vmem:[#allocation3 + $0x28] sm:$0xf] %vm403_vm2, %v385_v27  ;;  %v904_v27 = vpack.c.bf16 %v891_v23, %v891_v23  ;;  %vm881_vm2 = vcmask 222400  }
  0xae   : > { %501 = vst.msk [vmem:[#allocation3 + $0x10] sm:$0xf] %vm496_vm4, %v466_v29 }
  0xb1   : > { %922 = vrot.lane.b32.xlu0 %v896_v28, %s1428_s24  ;;  %942 = vrot.lane.b32.xlu1 %v906_v30, %s1428_s24  ;;  %v802_v28 = vld [vmem:[#allocation2 + $0x79] sm:$0xf] }
  0xb2   : > { %837 = vrot.lane.b32.xlu2 %v715_v5, %s1427_s23  ;;  %v705_v5 = vld [vmem:[#allocation2 + $0x51] sm:$0xff]  ;;  %v984_v30 = vld [vmem:[#allocation2 + $0x5b] sm:$0xff]  ;;  %v815_v33 = vpack.c.bf16 %v802_v28, %v802_v28 }
  0xb3   : > { %v462_v32 = vpop.permute.xlu0 %461  ;;  %v458_v34 = vpop.permute.xlu1 %457  ;;  %v1667_v11 = vpack.c.bf16 %v705_v5, %v705_v5  ;;  %v997_v35 = vpack.c.bf16 %v984_v30, %v984_v30 }
  0xb4   : > { %499 = vst.msk [vmem:[#allocation3 + $0x8] sm:$0xf] %vm496_vm4, %v462_v32  ;;  %v472_v37 = vpop.permute.xlu2 %471  ;;  %v892_v32 = vld [vmem:[#allocation2 + $0x62] sm:$0xff] }
  0xb5   : > { %497 = vst.msk [vmem:[#allocation3] sm:$0xf] %vm496_vm4, %v458_v34 }
  0xb6   : > { %504 = vst.msk [vmem:[#allocation3 + $0x1c] sm:$0xf] %vm496_vm4, %v472_v37 }
  0xb9   : > { %932 = vrot.lane.b32.xlu0 %v901_v36, %s1428_s24  ;;  %924 = vrot.lane.b32.xlu1 %v897_v38, %s1428_s24  ;;  %v905_v36 = vpack.c.bf16 %v892_v32, %v892_v32  ;;  %v606_v38 = vld [vmem:[#allocation2 + $0x20] sm:$0xff]  ;;  %v983_v32 = vld [vmem:[#allocation2 + $0x53] sm:$0xff] }
  0xba   : > { %944 = vrot.lane.b32.xlu2 %v907_v39, %s1428_s24 }
  0xbb   : > { %v468_v41 = vpop.permute.xlu0 %467  ;;  %v464_v43 = vpop.permute.xlu1 %463 }
  0xbc   : > { %502 = vst.msk [vmem:[#allocation3 + $0x14] sm:$0xf] %vm496_vm4, %v468_v41  ;;  %v478_v46 = vpop.permute.xlu2 %477 }
  0xbd   : > { %500 = vst.msk [vmem:[#allocation3 + $0xc] sm:$0xf] %vm496_vm4, %v464_v43  ;;  %v619_v43 = vpack.c.bf16 %v606_v38, %v606_v38 }
  0xbe   : > { %507 = vst.msk [vmem:[#allocation3 + $0x28] sm:$0xf] %vm496_vm4, %v478_v46  ;;  %v611_v46 = vld [vmem:[#allocation2 + $0x48] sm:$0xff] }
  0xc1   : > { %1015 = vrot.lane.b32.xlu0 %v989_v45, %s1429_s25  ;;  %1035 = vrot.lane.b32.xlu1 %v999_v47, %s1429_s25 }
  0xc2   : > { %930 = vrot.lane.b32.xlu2 %v900_v48, %s1428_s24  ;;  %v607_v48 = vld [vmem:[#allocation2 + $0x28] sm:$0xff] }
  0xc3   : > { %v474_v50 = vpop.permute.xlu0 %473  ;;  %v470_v52 = vpop.permute.xlu1 %469  ;;  %v620_v51 = vpack.c.bf16 %v607_v48, %v607_v48 }
  0xc4   : > { %505 = vst.msk [vmem:[#allocation3 + $0x20] sm:$0xf] %vm496_vm4, %v474_v50  ;;  %v551_v55 = vpop.permute.xlu2 %550  ;;  %v624_v50 = vpack.c.bf16 %v611_v46, %v611_v46 }
  0xc5   : > { %503 = vst.msk [vmem:[#allocation3 + $0x18] sm:$0xf] %vm496_vm4, %v470_v52  ;;  %v704_v52 = vld [vmem:[#allocation2 + $0x49] sm:$0xff] }
  0xc6   : > { %590 = vst.msk [vmem:[#allocation3] sm:$0xf] %vm589_vm6, %v551_v55 }
  0xc9   : > { %1025 = vrot.lane.b32.xlu0 %v994_v54, %s1429_s25  ;;  %1017 = vrot.lane.b32.xlu1 %v990_v56, %s1429_s25  ;;  %v700_v54 = vld [vmem:[#allocation2 + $0x29] sm:$0xff]  ;;  %v895_v56 = vld [vmem:[#allocation2 + $0x7a] sm:$0xf] }
  0xca   : > { %1037 = vrot.lane.b32.xlu2 %v1000_v57, %s1429_s25  ;;  %v717_v57 = vpack.c.bf16 %v704_v52, %v704_v52 }
  0xcb   : > { %v480_v59 = vpop.permute.xlu0 %479  ;;  %v476_v60 = vpop.permute.xlu1 %475 }
  0xcc   : > { %508 = vst.msk [vmem:[#allocation3 + $0x2c] sm:$0xf] %vm496_vm4, %v480_v59  ;;  %v557_v1 = vpop.permute.xlu2 %556  ;;  %v713_v59 = vpack.c.bf16 %v700_v54, %v700_v54 }
  0xcd   : > { %506 = vst.msk [vmem:[#allocation3 + $0x24] sm:$0xf] %vm496_vm4, %v476_v60  ;;  %vm1067_vm4 = vcmask 288000  }
  0xce   : > { %593 = vst.msk [vmem:[#allocation3 + $0xc] sm:$0xf] %vm589_vm6, %v557_v1 }
  0xd1   : > { %661 = vrot.lane.b32.xlu0 %v626_v63, %s1425_s21  ;;  %568 = vrot.lane.b32.xlu1 %v1559_v10, %s1424_s20  ;;  %v616_v10 = vld [vmem:[#allocation2 + $0x70] sm:$0xf] }
  0xd2   : > { %1023 = vrot.lane.b32.xlu2 %v993_v2, %s1429_s25  ;;  %v629_v17 = vpack.c.bf16 %v616_v10, %v616_v10  ;;  %v1086_v2 = vld [vmem:[%s1821_s1 + $0x10] sm:$0x3]  ;;  %v1383_v10 = vld [vmem:[%s1821_s1 + $0x8] sm:$0xff] }
  0xd3   : > { %v553_v4 = vpop.permute.xlu0 %552  ;;  %v482_v6 = vpop.permute.xlu1 %481 }
  0xd4   : > { %591 = vst.msk [vmem:[#allocation3 + $0x4] sm:$0xf] %vm589_vm6, %v553_v4  ;;  %v563_v9 = vpop.permute.xlu2 %562  ;;  %v1133_v4 = vunpack.c.l.b16 %v1086_v2 }
  0xd5   : > { %510 = vst.msk [vmem:[#allocation3 + $0x30] sm:$0x3] %vm509_vm7, %v482_v6  ;;  %v885_v6 = vld [vmem:[#allocation2 + $0x2a] sm:$0xff] }
  0xd6   : > { %596 = vst.msk [vmem:[#allocation3 + $0x18] sm:$0xf] %vm589_vm6, %v563_v9  ;;  %v1136_v5 = vpack.c.b16 %v1133_v4, %v1133_v4 }
  0xd8   : > { %v1163_v7 = vsel %vm1161_vm11, %v1136_v5, 0 }
  0xd9   : > { %574 = vrot.lane.b32.xlu0 %v536_v8, %s1424_s20  ;;  %752 = vrot.lane.b32.xlu1 %v1667_v11, %s1426_s22 }
  0xda   : > { %659 = vrot.lane.b32.xlu2 %v625_v12, %s1425_s21  ;;  %1386 = vmatpush.bf16.msra.mxu3 %v1163_v7  ;;  %v898_v12 = vpack.c.bf16 %v885_v6, %v885_v6 }
  0xdb   : > { %v559_v13 = vpop.permute.xlu0 %558  ;;  %v555_v16 = vpop.permute.xlu1 %554  ;;  %1170 = vmatpush.bf16.msra.mxu0 %v1163_v7  ;;  %1384 = vmatpush.bf16.msra.mxu1 %v1163_v7 }
  0xdc   : > { %594 = vst.msk [vmem:[#allocation3 + $0x10] sm:$0xf] %vm589_vm6, %v559_v13  ;;  %v571_v18 = vpop.permute.xlu2 %570  ;;  %1385 = vmatpush.bf16.msra.mxu2 %v1163_v7  ;;  %v890_v13 = vld [vmem:[#allocation2 + $0x52] sm:$0xff] }
  0xdd   : > { %592 = vst.msk [vmem:[#allocation3 + $0x8] sm:$0xf] %vm589_vm6, %v555_v16  ;;  %v886_v16 = vld [vmem:[#allocation2 + $0x32] sm:$0xff] }
  0xde   : > { %600 = vst.msk [vmem:[#allocation3 + $0x28] sm:$0xf] %vm589_vm6, %v571_v18  ;;  %1389 = vmatpush.bf16.msra.mxu3 %v1383_v10  ;;  %v903_v18 = vpack.c.bf16 %v890_v13, %v890_v13  ;;  %v899_v20 = vpack.c.bf16 %v886_v16, %v886_v16 }
  0xdf   : > { %1171 = vmatpush.bf16.msra.mxu0 %v1383_v10  ;;  %1387 = vmatpush.bf16.msra.mxu1 %v1383_v10 }
  0xe0   : > { %1388 = vmatpush.bf16.msra.mxu2 %v1383_v10 }
  0xe1   : > { %667 = vrot.lane.b32.xlu0 %v629_v17, %s1425_s21  ;;  %845 = vrot.lane.b32.xlu1 %v811_v19, %s1427_s23 }
  0xe2   : > { %754 = vrot.lane.b32.xlu2 %v811_v19, %s1426_s22 }
  0xe3   : > { %v565_v0 = vpop.permute.xlu0 %564  ;;  %v561_v24 = vpop.permute.xlu1 %560 }
  0xe4   : > { %597 = vst.msk [vmem:[#allocation3 + $0x1c] sm:$0xf] %vm589_vm6, %v565_v0  ;;  %v666_v26 = vpop.permute.xlu2 %665  ;;  %v982_v0 = vld [vmem:[#allocation2 + $0x4b] sm:$0xff] }
  0xe5   : > { %595 = vst.msk [vmem:[#allocation3 + $0x14] sm:$0xf] %vm589_vm6, %v561_v24  ;;  %v978_v24 = vld [vmem:[#allocation2 + $0x2b] sm:$0xff] }
  0xe9   : > { %760 = vrot.lane.b32.xlu0 %v722_v25, %s1426_s22  ;;  %938 = vrot.lane.b32.xlu1 %v904_v27, %s1428_s24  ;;  %v995_v27 = vpack.c.bf16 %v982_v0, %v982_v0 }
  0xea   : > { %847 = vrot.lane.b32.xlu2 %v1602_v61, %s1427_s23  ;;  %v610_v61 = vld [vmem:[#allocation2 + $0x40] sm:$0xff] }
  0xeb   : > { %v573_v29 = vpop.permute.xlu0 %572  ;;  %v567_v31 = vpop.permute.xlu1 %566  ;;  %v623_v41 = vpack.c.bf16 %v610_v61, %v610_v61 }
  0xec   : > { %601 = vst.msk [vmem:[#allocation3 + $0x2c] sm:$0xf] %vm589_vm6, %v573_v29  ;;  %v652_v34 = vpop.permute.xlu2 %651  ;;  %v991_v29 = vpack.c.bf16 %v978_v24, %v978_v24  ;;  %v1412_v24 = vld [vmem:[%s1822_s2] ss:$0 sm:$0xff] }
  0xed   : > { %598 = vst.msk [vmem:[#allocation3 + $0x20] sm:$0xf] %vm589_vm6, %v567_v31 }
  0xee   : > { %694 = vst.msk [vmem:[#allocation3 + $0x2c] sm:$0xf] %vm682_vm8, %v666_v26  ;;  %v889_v26 = vld [vmem:[#allocation2 + $0x4a] sm:$0xff] }
  0xef   : > { %687 = vst.msk [vmem:[#allocation3 + $0x10] sm:$0xf] %vm682_vm8, %v652_v34  ;;  %v902_v30 = vpack.c.bf16 %v889_v26, %v889_v26 }
  0xf1   : > { %853 = vrot.lane.b32.xlu0 %v815_v33, %s1427_s23  ;;  %1031 = vrot.lane.b32.xlu1 %v997_v35, %s1429_s25  ;;  %v979_v33 = vld [vmem:[#allocation2 + $0x33] sm:$0xff]  ;;  %v996_v35 = vpack.c.bf16 %v983_v32, %v983_v32 }
  0xf2   : > { %940 = vrot.lane.b32.xlu2 %v905_v36, %s1428_s24  ;;  %v992_v36 = vpack.c.bf16 %v979_v33, %v979_v33 }
  0xf3   : > { %v644_v37 = vpop.permute.xlu0 %643  ;;  %v664_v39 = vpop.permute.xlu1 %663 }
  0xf4   : > { %683 = vst.msk [vmem:[#allocation3] sm:$0xf] %vm682_vm8, %v644_v37  ;;  %v759_v42 = vpop.permute.xlu2 %758 }
  0xf5   : > { %693 = vst.msk [vmem:[#allocation3 + $0x28] sm:$0xf] %vm682_vm8, %v664_v39 }
  0xf6   : > { %787 = vst.msk [vmem:[#allocation3 + $0x2c] sm:$0xf] %vm775_vm9, %v759_v42 }
  0xf9   : > { %655 = vrot.lane.b32.xlu0 %v623_v41, %s1425_s21  ;;  %647 = vrot.lane.b32.xlu1 %v619_v43, %s1425_s21 }
  0xfa   : > { %1033 = vrot.lane.b32.xlu2 %v998_v44, %s1429_s25 }
  0xfb   : > { %v654_v45 = vpop.permute.xlu0 %653  ;;  %v646_v47 = vpop.permute.xlu1 %645 }
  0xfc   : > { %688 = vst.msk [vmem:[#allocation3 + $0x14] sm:$0xf] %vm682_vm8, %v654_v45  ;;  %v745_v49 = vpop.permute.xlu2 %744 }
  0xfd   : > { %684 = vst.msk [vmem:[#allocation3 + $0x4] sm:$0xf] %vm682_vm8, %v646_v47 }
  0xfe   : > { %780 = vst.msk [vmem:[#allocation3 + $0x10] sm:$0xf] %vm775_vm9, %v745_v49 }
 0x101   : > { %740 = vrot.lane.b32.xlu0 %v1628_v22, %s1426_s22  ;;  %657 = vrot.lane.b32.xlu1 %v624_v50, %s1425_s21  ;;  %v908_v22 = vpack.c.bf16 %v895_v56, %v895_v56 }
 0x102   : > { %649 = vrot.lane.b32.xlu2 %v620_v51, %s1425_s21 }
 0x103   : > { %v737_v53 = vpop.permute.xlu0 %736  ;;  %v757_v55 = vpop.permute.xlu1 %756 }
 0x104   : > { %776 = vst.msk [vmem:[#allocation3] sm:$0xf] %vm775_vm9, %v737_v53  ;;  %v852_v58 = vpop.permute.xlu2 %851 }
 0x105   : > { %786 = vst.msk [vmem:[#allocation3 + $0x28] sm:$0xf] %vm775_vm9, %v757_v55 }
 0x106   : > { %880 = vst.msk [vmem:[#allocation3 + $0x2c] sm:$0xf] %vm868_vm10, %v852_v58 }
 0x109   : > { %750 = vrot.lane.b32.xlu0 %v717_v57, %s1426_s22  ;;  %742 = vrot.lane.b32.xlu1 %v713_v59, %s1426_s22 }
 0x10a   : > { %946 = vrot.lane.b32.xlu2 %v908_v22, %s1428_s24 }
 0x10b   : > { %v747_v60 = vpop.permute.xlu0 %746  ;;  %v739_v63 = vpop.permute.xlu1 %738 }
 0x10c   : > { %781 = vst.msk [vmem:[#allocation3 + $0x14] sm:$0xf] %vm775_vm9, %v747_v60  ;;  %v838_v1 = vpop.permute.xlu2 %837 }
 0x10d   : > { %777 = vst.msk [vmem:[#allocation3 + $0x4] sm:$0xf] %vm775_vm9, %v739_v63 }
 0x10e   : > { %873 = vst.msk [vmem:[#allocation3 + $0x10] sm:$0xf] %vm868_vm10, %v838_v1 }
 0x111   : > { %835 = vrot.lane.b32.xlu0 %v1618_v15, %s1427_s23  ;;  %1039 = vrot.lane.b32.xlu1 %v1001_v3, %s1429_s25 }
 0x112   : > { %748 = vrot.lane.b32.xlu2 %v1626_v21, %s1426_s22  ;;  %v1382_v21 = vld [vmem:[%s1821_s1] sm:$0xff] }
 0x113   : > { %v830_v8 = vpop.permute.xlu0 %829  ;;  %v850_v9 = vpop.permute.xlu1 %849  ;;  %1392 = vmatpush.bf16.msra.mxu3 %v1382_v21  ;;  %1172 = vmatpush.bf16.msra.mxu0 %v1382_v21 }
 0x114   : > { %869 = vst.msk [vmem:[#allocation3] sm:$0xf] %vm868_vm10, %v830_v8  ;;  %v945_v15 = vpop.permute.xlu2 %944  ;;  %1390 = vmatpush.bf16.msra.mxu1 %v1382_v21  ;;  %1391 = vmatpush.bf16.msra.mxu2 %v1382_v21 }
 0x115   : > { %879 = vst.msk [vmem:[#allocation3 + $0x28] sm:$0xf] %vm868_vm10, %v850_v9 }
 0x116   : > { %973 = vst.msk [vmem:[#allocation3 + $0x2c] sm:$0xf] %vm961_vm12, %v945_v15 }
 0x119   : > { %926 = vrot.lane.b32.xlu0 %v898_v12, %s1428_s24  ;;  %841 = vrot.lane.b32.xlu1 %v717_v57, %s1427_s23 }
 0x11a   : > { %833 = vrot.lane.b32.xlu2 %v713_v59, %s1427_s23 }
 0x11b   : > { %v840_v14 = vpop.permute.xlu0 %839  ;;  %v832_v17 = vpop.permute.xlu1 %831 }
 0x11c   : > { %874 = vst.msk [vmem:[#allocation3 + $0x14] sm:$0xf] %vm868_vm10, %v840_v14  ;;  %v931_v19 = vpop.permute.xlu2 %930 }
 0x11d   : > { %870 = vst.msk [vmem:[#allocation3 + $0x4] sm:$0xf] %vm868_vm10, %v832_v17 }
 0x11e   : > { %966 = vst.msk [vmem:[#allocation3 + $0x10] sm:$0xf] %vm961_vm12, %v931_v19 }
 0x121   : > { %936 = vrot.lane.b32.xlu0 %v903_v18, %s1428_s24  ;;  %928 = vrot.lane.b32.xlu1 %v899_v20, %s1428_s24 }
 0x122   : > { %843 = vrot.lane.b32.xlu2 %v1667_v11, %s1427_s23 }
 0x123   : > { %v923_v23 = vpop.permute.xlu0 %922  ;;  %v943_v25 = vpop.permute.xlu1 %942 }
 0x124   : > { %962 = vst.msk [vmem:[#allocation3] sm:$0xf] %vm961_vm12, %v923_v23  ;;  %v1038_v28 = vpop.permute.xlu2 %1037 }
 0x125   : > { %972 = vst.msk [vmem:[#allocation3 + $0x28] sm:$0xf] %vm961_vm12, %v943_v25 }
 0x126   : > { %1066 = vst.msk [vmem:[#allocation3 + $0x2c] sm:$0xf] %vm1054_vm13, %v1038_v28 }
 0x129   : > { %1027 = vrot.lane.b32.xlu0 %v995_v27, %s1429_s25  ;;  %1019 = vrot.lane.b32.xlu1 %v991_v29, %s1429_s25 }
 0x12a   : > { %934 = vrot.lane.b32.xlu2 %v902_v30, %s1428_s24 }
 0x12b   : > { %v933_v31 = vpop.permute.xlu0 %932  ;;  %v925_v11 = vpop.permute.xlu1 %924 }
 0x12c   : > { %967 = vst.msk [vmem:[#allocation3 + $0x14] sm:$0xf] %vm961_vm12, %v933_v31  ;;  %v1024_v34 = vpop.permute.xlu2 %1023 }
 0x12d   : > { %963 = vst.msk [vmem:[#allocation3 + $0x4] sm:$0xf] %vm961_vm12, %v925_v11 }
 0x12e   : > { %1059 = vst.msk [vmem:[#allocation3 + $0x10] sm:$0xf] %vm1054_vm13, %v1024_v34 }
 0x131   : > { %1029 = vrot.lane.b32.xlu1 %v996_v35, %s1429_s25 }
 0x132   : > { %1021 = vrot.lane.b32.xlu2 %v992_v36, %s1429_s25 }
 0x133   : > { %v1016_v61 = vpop.permute.xlu0 %1015  ;;  %v1036_v37 = vpop.permute.xlu1 %1035 }
 0x134   : > { %1055 = vst.msk [vmem:[#allocation3] sm:$0xf] %vm1054_vm13, %v1016_v61  ;;  %v660_v38 = vpop.permute.xlu2 %659 }
 0x135   : > { %1065 = vst.msk [vmem:[#allocation3 + $0x28] sm:$0xf] %vm1054_vm13, %v1036_v37 }
 0x136   : > { %691 = vst.msk [vmem:[#allocation3 + $0x20] sm:$0xf] %vm682_vm8, %v660_v38 }
 0x13b   : > { %v1026_v39 = vpop.permute.xlu0 %1025  ;;  %v1018_v40 = vpop.permute.xlu1 %1017 }
 0x13c   : > { %1060 = vst.msk [vmem:[#allocation3 + $0x14] sm:$0xf] %vm1054_vm13, %v1026_v39  ;;  %v1381_v41 = vld [vmem:[#allocation3 + $0x28] sm:$0xff]  ;;  %v755_v42 = vpop.permute.xlu2 %754 }
 0x13d   : > { %1056 = vst.msk [vmem:[#allocation3 + $0x4] sm:$0xf] %vm1054_vm13, %v1018_v40  ;;  %1372 = vmatmul.msk.bf16.vlgmr.msra.gmra.mxu3 %vm1139_vm14, %v1381_v41 }
 0x143   : > { %v1378_v43 = vld [vmem:[#allocation3 + $0x10] sm:$0xff]  ;;  %v662_v44 = vpop.permute.xlu0 %661  ;;  %v569_v45 = vpop.permute.xlu1 %568 }
 0x144   : > { %v1376_v46 = vld [vmem:[#allocation3] sm:$0xff]  ;;  %599 = vst.msk [vmem:[#allocation3 + $0x24] sm:$0xf] %vm589_vm6, %v569_v45  ;;  %1369 = vmatmul.msk.bf16.vlgmr.msra.gmra.mxu1 %vm1139_vm14, %v1378_v43  ;;  %v848_v47 = vpop.permute.xlu2 %847 }
 0x145   : > { %1367 = vmatmul.msk.bf16.vlgmr.msra.gmra.mxu0 %vm1139_vm14, %v1376_v46  ;;  %692 = vst.msk [vmem:[#allocation3 + $0x24] sm:$0xf] %vm682_vm8, %v662_v44 }
 0x146   : > { %785 = vst.msk [vmem:[#allocation3 + $0x24] sm:$0xf] %vm775_vm9, %v755_v42 }
 0x147   : > { %878 = vst.msk [vmem:[#allocation3 + $0x24] sm:$0xf] %vm868_vm10, %v848_v47 }
 0x14b   : > { %v575_v48 = vpop.permute.xlu0 %574  ;;  %v753_v49 = vpop.permute.xlu1 %752 }
 0x14c   : > { %603 = vst.msk [vmem:[#allocation3 + $0x30] sm:$0x3] %vm602_vm15, %v575_v48  ;;  %v941_v50 = vpop.permute.xlu2 %940 }
 0x14d   : > { %784 = vst.msk [vmem:[#allocation3 + $0x20] sm:$0xf] %vm775_vm9, %v753_v49 }
 0x14e   : > { %971 = vst.msk [vmem:[#allocation3 + $0x24] sm:$0xf] %vm961_vm12, %v941_v50 }
 0x153   : > { %v668_v51 = vpop.permute.xlu0 %667  ;;  %v846_v52 = vpop.permute.xlu1 %845 }
 0x154   : > { %696 = vst.msk [vmem:[#allocation3 + $0x30] sm:$0x3] %vm695_vm0, %v668_v51  ;;  %v1034_v53 = vpop.permute.xlu2 %1033 }
 0x155   : > { %877 = vst.msk [vmem:[#allocation3 + $0x20] sm:$0xf] %vm868_vm10, %v846_v52 }
 0x156   : > { %1064 = vst.msk [vmem:[#allocation3 + $0x24] sm:$0xf] %vm1054_vm13, %v1034_v53 }
 0x15b   : > { %v761_v54 = vpop.permute.xlu0 %760  ;;  %v939_v55 = vpop.permute.xlu1 %938 }
 0x15c   : > { %789 = vst.msk [vmem:[#allocation3 + $0x30] sm:$0x3] %vm788_vm1, %v761_v54  ;;  %v650_v56 = vpop.permute.xlu2 %649 }
 0x15d   : > { %970 = vst.msk [vmem:[#allocation3 + $0x20] sm:$0xf] %vm961_vm12, %v939_v55 }
 0x15e   : > { %686 = vst.msk [vmem:[#allocation3 + $0xc] sm:$0xf] %vm682_vm8, %v650_v56 }
 0x163   : > { %v854_v57 = vpop.permute.xlu0 %853  ;;  %v1032_v58 = vpop.permute.xlu1 %1031 }
 0x164   : > { %882 = vst.msk [vmem:[#allocation3 + $0x30] sm:$0x3] %vm881_vm2, %v854_v57  ;;  %v947_v59 = vpop.permute.xlu2 %946 }
 0x165   : > { %1063 = vst.msk [vmem:[#allocation3 + $0x20] sm:$0xf] %vm1054_vm13, %v1032_v58 }
 0x166   : > { %975 = vst.msk [vmem:[#allocation3 + $0x30] sm:$0x3] %vm974_vm3, %v947_v59 }
 0x16b   : > { %v656_v22 = vpop.permute.xlu0 %655  ;;  %v648_v60 = vpop.permute.xlu1 %647 }
 0x16c   : > { %v1380_v62 = vld [vmem:[#allocation3 + $0x20] sm:$0xff]  ;;  %689 = vst.msk [vmem:[#allocation3 + $0x18] sm:$0xf] %vm682_vm8, %v656_v22  ;;  %v749_v63 = vpop.permute.xlu2 %748 }
 0x16d   : > { %685 = vst.msk [vmem:[#allocation3 + $0x8] sm:$0xf] %vm682_vm8, %v648_v60  ;;  %1371 = vmatmul.msk.bf16.vlgmr.msra.gmra.mxu2 %vm1139_vm14, %v1380_v62 }
 0x16e   : > { %782 = vst.msk [vmem:[#allocation3 + $0x18] sm:$0xf] %vm775_vm9, %v749_v63 }
 0x173   : > { %v741_v1 = vpop.permute.xlu0 %740  ;;  %v658_v2 = vpop.permute.xlu1 %657 }
 0x174   : > { %778 = vst.msk [vmem:[#allocation3 + $0x8] sm:$0xf] %vm775_vm9, %v741_v1  ;;  %v834_v3 = vpop.permute.xlu2 %833 }
 0x175   : > { %690 = vst.msk [vmem:[#allocation3 + $0x1c] sm:$0xf] %vm682_vm8, %v658_v2 }
 0x176   : > { %871 = vst.msk [vmem:[#allocation3 + $0x8] sm:$0xf] %vm868_vm10, %v834_v3 }
 0x17b   : > { %v751_v4 = vpop.permute.xlu0 %750  ;;  %v743_v5 = vpop.permute.xlu1 %742 }
 0x17c   : > { %783 = vst.msk [vmem:[#allocation3 + $0x1c] sm:$0xf] %vm775_vm9, %v751_v4  ;;  %v844_v6 = vpop.permute.xlu2 %843 }
 0x17d   : > { %779 = vst.msk [vmem:[#allocation3 + $0xc] sm:$0xf] %vm775_vm9, %v743_v5 }
 0x17e   : > { %876 = vst.msk [vmem:[#allocation3 + $0x1c] sm:$0xf] %vm868_vm10, %v844_v6 }
 0x183   : > { %v836_v7 = vpop.permute.xlu0 %835  ;;  %v1040_v8 = vpop.permute.xlu1 %1039 }
 0x184   : > { %872 = vst.msk [vmem:[#allocation3 + $0xc] sm:$0xf] %vm868_vm10, %v836_v7  ;;  %v935_v9 = vpop.permute.xlu2 %934 }
 0x185   : > { %1068 = vst.msk [vmem:[#allocation3 + $0x30] sm:$0x3] %vm1067_vm4, %v1040_v8 }
 0x18b   : > { %v927_v12 = vpop.permute.xlu0 %926  ;;  %v842_v15 = vpop.permute.xlu1 %841 }
 0x18c   : > { %v1081_v10 = vld [vmem:[#allocation3 + $0x30] sm:$0x3]  ;;  %964 = vst.msk [vmem:[#allocation3 + $0x8] sm:$0xf] %vm961_vm12, %v927_v12  ;;  %v1022_v14 = vpop.permute.xlu2 %1021 }
 0x18d   : > { %875 = vst.msk [vmem:[#allocation3 + $0x18] sm:$0xf] %vm868_vm10, %v842_v15  ;;  %v1116_v21 = vunpack.c.l.b16 %v1081_v10 }
 0x18e   : > { %968 = vst.msk [vmem:[#allocation3 + $0x18] sm:$0xf] %vm961_vm12, %v935_v9 }
 0x18f   : > { %v1123_v13 = vpack.c.b16 %v1116_v21, %v1116_v21 }
 0x191   : > { %1373 = vmatmul.msk.bf16.gmra.mxu3 %vm1139_vm14, %v1123_v13 }
 0x193   : > { %v937_v16 = vpop.permute.xlu0 %936  ;;  %v929_v17 = vpop.permute.xlu1 %928 }
 0x194   : > { %969 = vst.msk [vmem:[#allocation3 + $0x1c] sm:$0xf] %vm961_vm12, %v937_v16 }
 0x195   : > { %965 = vst.msk [vmem:[#allocation3 + $0xc] sm:$0xf] %vm961_vm12, %v929_v17 }
 0x196   : > { %1058 = vst.msk [vmem:[#allocation3 + $0xc] sm:$0xf] %vm1054_vm13, %v1022_v14 }
 0x19b   : > { %v1028_v18 = vpop.permute.xlu0 %1027  ;;  %v1020_v19 = vpop.permute.xlu1 %1019 }
 0x19c   : > { %1061 = vst.msk [vmem:[#allocation3 + $0x18] sm:$0xf] %vm1054_vm13, %v1028_v18 }
 0x19d   : > { %1057 = vst.msk [vmem:[#allocation3 + $0x8] sm:$0xf] %vm1054_vm13, %v1020_v19 }
 0x1a3   : > { %v1030_v20 = vpop.permute.xlu1 %1029 }
 0x1a4   : > { %v1377_v0 = vld [vmem:[#allocation3 + $0x8] sm:$0xff]  ;;  %1062 = vst.msk [vmem:[#allocation3 + $0x1c] sm:$0xf] %vm1054_vm13, %v1030_v20 }
 0x1a5   : > { %1368 = vmatmul.msk.bf16.gmra.mxu0 %vm1139_vm14, %v1377_v0 }
 0x1ab   : > { %v1379_v23 = vld [vmem:[#allocation3 + $0x18] sm:$0xff] }
 0x1ac   : > { %1370 = vmatmul.msk.bf16.gmra.mxu1 %vm1139_vm14, %v1379_v23 }
 0x1c0   : > { %v1199_v25 = vpop.f32.mrf.mxu3 }
 0x1c1   : > { %v1200_v26 = vadd.f32 %v1412_v24, %v1199_v25  ;;  %v1184_v27 = vpop.f32.mrf.mxu1 }
 0x1c2   : > { %v1174_v28 = vpop.f32.mrf.mxu0  ;;  %v1185_v29 = vadd.f32 %v1412_v24, %v1184_v27 }
 0x1c3   : > { %v1218_v30 = vmax.f32 %v1200_v26, 0.0  ;;  %v1175_v31 = vadd.f32 %v1412_v24, %v1174_v28 }
 0x1c4   : > { %v1212_v32 = vmax.f32 %v1185_v29, 0.0 }
 0x1c5   : > { %1231 = vst [vmem:[%s1802_s10 + $0x50] sm:$0xff] %v1218_v30  ;;  %v1208_v11 = vmax.f32 %v1175_v31, 0.0 }
 0x1c6   : > { %1225 = vst [vmem:[%s1802_s10 + $0x20] sm:$0xff] %v1212_v32 }
 0x1c7   : > { %1221 = vst [vmem:[%s1802_s10] sm:$0xff] %v1208_v11 }
 0x1c8   : > { %v1201_v33 = vpop.f32.mrf.mxu3 }
 0x1c9   : > { %v1202_v34 = vadd.f32 %v1412_v24, %v1201_v33  ;;  %v1186_v35 = vpop.f32.mrf.mxu1 }
 0x1ca   : > { %v1176_v36 = vpop.f32.mrf.mxu0  ;;  %v1187_v61 = vadd.f32 %v1412_v24, %v1186_v35 }
 0x1cb   : > { %v1219_v37 = vmax.f32 %v1202_v34, 0.0  ;;  %v1177_v38 = vadd.f32 %v1412_v24, %v1176_v36 }
 0x1cc   : > { %v1213_v39 = vmax.f32 %v1187_v61, 0.0 }
 0x1cd   : > { %1232 = vst [vmem:[%s1802_s10 + $0x58] sm:$0xff] %v1219_v37  ;;  %v1209_v40 = vmax.f32 %v1177_v38, 0.0 }
 0x1ce   : > { %1226 = vst [vmem:[%s1802_s10 + $0x28] sm:$0xff] %v1213_v39 }
 0x1cf   : > { %1222 = vst [vmem:[%s1802_s10 + $0x8] sm:$0xff] %v1209_v40 }
 0x1f0   : > { %v1194_v41 = vpop.f32.mrf.mxu2 }
 0x1f1   : > { %v1195_v42 = vadd.f32 %v1412_v24, %v1194_v41 }
 0x1f3   : > { %v1216_v43 = vmax.f32 %v1195_v42, 0.0 }
 0x1f5   : > { %1229 = vst [vmem:[%s1802_s10 + $0x40] sm:$0xff] %v1216_v43 }
 0x1f8   : > { %v1196_v44 = vpop.f32.mrf.mxu2 }
 0x1f9   : > { %v1197_v45 = vadd.f32 %v1412_v24, %v1196_v44 }
 0x1fb   : > { %v1217_v46 = vmax.f32 %v1197_v45, 0.0 }
 0x1fd   : > { %1230 = vst [vmem:[%s1802_s10 + $0x48] sm:$0xff] %v1217_v46 }
 0x214   : > { %v1204_v47 = vpop.f32.mrf.mxu3 }
 0x215   : > { %v1205_v48 = vadd.f32 %v1412_v24, %v1204_v47 }
 0x217   : > { %v1220_v49 = vmax.f32 %v1205_v48, 0.0 }
 0x219   : > { %1233 = vst [vmem:[%s1802_s10 + $0x60] sm:$0xf] %v1220_v49 }
 0x21c   : > { %v1206_v50 = vpop.f32.mrf.mxu3 }
 0x222   : > { %v1179_v51 = vpop.f32.mrf.mxu0 }
 0x223   : > { %v1180_v52 = vadd.f32 %v1412_v24, %v1179_v51 }
 0x225   : > { %v1210_v53 = vmax.f32 %v1180_v52, 0.0 }
 0x227   : > { %1223 = vst [vmem:[%s1802_s10 + $0x10] sm:$0xff] %v1210_v53 }
 0x229   : > { %v1189_v55 = vpop.f32.mrf.mxu1 }
 0x22a   : > { %v1181_v54 = vpop.f32.mrf.mxu0  ;;  %v1190_v57 = vadd.f32 %v1412_v24, %v1189_v55 }
 0x22b   : > { %v1182_v56 = vadd.f32 %v1412_v24, %v1181_v54 }
 0x22c   : > { %v1214_v59 = vmax.f32 %v1190_v57, 0.0 }
 0x22d   : > { %v1211_v58 = vmax.f32 %v1182_v56, 0.0 }
 0x22e   : > { %1227 = vst [vmem:[%s1802_s10 + $0x30] sm:$0xff] %v1214_v59 }
 0x22f   : > { %1224 = vst [vmem:[%s1802_s10 + $0x18] sm:$0xff] %v1211_v58 }
 0x231   : > { %v1191_v22 = vpop.f32.mrf.mxu1 }
 0x232   : > { %v1192_v60 = vadd.f32 %v1412_v24, %v1191_v22 }
 0x234   : > { %v1215_v62 = vmax.f32 %v1192_v60, 0.0 }
 0x236   : > { %1228 = vst [vmem:[%s1802_s10 + $0x38] sm:$0xff] %v1215_v62 }
 0x237 PF: > { %s13_s12 = sadd.s32 1, %s1419_s12  }
 0x238   : > { %p10_p4 = scmp.ge.s32.totalorder %s13_s12, 4  }
 0x23a   :  { %12 = sbr.rel (!%p10_p4) target bundleno = 1 (0x1), region = 65 }

// kernel: tpu_custom_call.1
= control target key start
LH: loop header
LB: loop body
LE: loop exit
PB: predicated region body
PF: predicated region fallthrough
CT: control target
= control target key end

     0   :  { %s1450_s12 = smov 0   ;;  %s1820_s0 = inlined_call_operand.vmem [shape: f32[2,4,100,4], index: 0, kind: input, shape index: {}]   ;;  %s1821_s1 = inlined_call_operand.vmem [shape: bf16[36,128], index: 1, kind: input, shape index: {}]   ;;  %s1822_s2 = inlined_call_operand.vmem [shape: f32[1,128], index: 2, kind: input, shape index: {}]   ;;  %s1823_s3 = inlined_call_operand.vmem [shape: f32[2,100,128], index: 3, kind: output, shape index: {}]  }
   0x1 LB: > { %s1289_s13 = sadd.s32 4294967295, %s1419_s12   ;;  %p1293_p0 = scmp.ge.s32.totalorder %s1419_s12, 1  ;;  %s1419_s12 = sphi %s1450_s12, %s13_s12  }
   0x2   : > { %p137_p1 = scmp.lt.s32.totalorder %s1419_s12, 3 }
   0x4   : > { %p138_p2 = pnand %p1293_p0, %p137_p1 }
   0x5   : > { %p161_p3 = scmp.lt.s32.totalorder (!%p138_p2), %s1289_s13, 1  ;;  %s1422_s18 = smov (!%p138_p2), 4  }
   0x6   : > { %141 = sbr.rel (%p138_p2) target bundleno = 567 (0x237), region = 32  ;;  %s1423_s19 = smov (!%p138_p2), 8  }
   0x7   : > { %s1424_s20 = smov (!%p138_p2), 12   ;;  %s1425_s21 = smov (!%p138_p2), 16  }
   0x8   : > { %s1426_s22 = smov (!%p138_p2), 20   ;;  %s1427_s23 = smov (!%p138_p2), 24  }
   0x9   : > { %s1428_s24 = smov (!%p138_p2), 28   ;;  %s1429_s25 = smov (!%p138_p2), 32  }
   0xb   : > { %vm266_vm0 = vcmask 31744   ;;  %v1421_v0 = vmov 0.0   ;;  %s1825_s13 = smov (!%p161_p3, %s1289_s13), 1  ;;  %vm281_vm1 = vcmask 27648   ;;  %vm403_vm2 = vcmask 60448  }
   0xc   : > { %267 = vst.msk [vmem:[#allocation2] sm:$0xff] %vm266_vm0, %v1421_v0  ;;  %s1393_s14 = smul.u32 416, %s1825_s13  ;;  %vm323_vm3 = vcmask 25600   ;;  %vm496_vm4 = vcmask 93248   ;;  %vm416_vm5 = vcmask 58400   ;;  %vm589_vm6 = vcmask 126048  }
   0xd   : > { %268 = vst.msk [vmem:[#allocation2 + $0x8] sm:$0xff] %vm266_vm0, %v1421_v0  ;;  %vm509_vm7 = vcmask 91200   ;;  %vm682_vm8 = vcmask 158848   ;;  %vm775_vm9 = vcmask 191648   ;;  %vm868_vm10 = vcmask 224448   ;;  %s1394_s7 = smul.u32 104, %s1825_s13 }
   0xe   : > { %283 = vst.msk [vmem:[#allocation2 + $0x74] sm:$0xff] %vm266_vm0, %v1421_v0  ;;  %s1470_s17 = scalar_lea.vmem %s1820_s0, %s1393_s14  ;;  %vm1161_vm11 = vcmask 1041408   ;;  %vm961_vm12 = vcmask 257248   ;;  %vm1054_vm13 = vcmask 290048   ;;  %vm1139_vm14 = vcmask 293888  }
   0xf   : > { %v172_v1 = vld [vmem:[%s1470_s17] sm:$0xff]  ;;  %v173_v2 = vld [vmem:[%s1470_s17 + $0x8] sm:$0xff]  ;;  %v1297_v4 = vld [vmem:[%s1470_s17 + $0x70] sm:$0xff]  ;;  %284 = vst.msk [vmem:[#allocation2 + $0x7c] sm:$0xf] %vm281_vm1, %v1421_v0  ;;  %vm602_vm15 = vcmask 124000   ;;  %s1802_s10 = scalar_lea.vmem %s1823_s3, %s1394_s7 }
  0x10   : > { %v1296_v3 = vld [vmem:[%s1470_s17 + $0x68] sm:$0xff]  ;;  %v1309_v6 = vld [vmem:[%s1470_s17 + $0xd0] sm:$0xff]  ;;  %v1310_v7 = vld [vmem:[%s1470_s17 + $0xd8] sm:$0xff]  ;;  %v200_v9 = vmax.f32 %v173_v2, %v1297_v4 }
  0x11   : > { %v199_v5 = vmax.f32 %v172_v1, %v1296_v3  ;;  %v1322_v10 = vld [vmem:[%s1470_s17 + $0x138] sm:$0xff]  ;;  %v1323_v11 = vld [vmem:[%s1470_s17 + $0x140] sm:$0xff]  ;;  %v174_v15 = vld [vmem:[%s1470_s17 + $0x10] sm:$0xff] }
  0x12   : > { %v240_v13 = vmax.f32 %v1309_v6, %v1322_v10  ;;  %v241_v14 = vmax.f32 %v1310_v7, %v1323_v11  ;;  %v1298_v16 = vld [vmem:[%s1470_s17 + $0x78] sm:$0xff]  ;;  %v1311_v17 = vld [vmem:[%s1470_s17 + $0xe0] sm:$0xff]  ;;  %v1324_v19 = vld [vmem:[%s1470_s17 + $0x148] sm:$0xff] }
  0x13   : > { %v201_v18 = vmax.f32 %v174_v15, %v1298_v16  ;;  %v176_v20 = vld [vmem:[%s1470_s17 + $0x20] sm:$0xff]  ;;  %v177_v21 = vld [vmem:[%s1470_s17 + $0x28] sm:$0xff]  ;;  %v242_v24 = vmax.f32 %v1311_v17, %v1324_v19  ;;  %v1301_v26 = vld [vmem:[%s1470_s17 + $0x90] sm:$0xff] }
  0x14   : > { %v325_v8 = vld [vmem:[#allocation2 + $0x6] sm:$0xff]  ;;  %v253_v22 = vmax.f32 %v199_v5, %v240_v13  ;;  %v254_v23 = vmax.f32 %v200_v9, %v241_v14  ;;  %v1313_v27 = vld [vmem:[%s1470_s17 + $0xf0] sm:$0xff]  ;;  %v204_v29 = vmax.f32 %v177_v21, %v1301_v26  ;;  %v1314_v30 = vld [vmem:[%s1470_s17 + $0xf8] sm:$0xff] }
  0x15   : > { %v338_v12 = vpack.c.bf16 %v325_v8, %v325_v8  ;;  %v1300_v25 = vld [vmem:[%s1470_s17 + $0x88] sm:$0xff]  ;;  %v1326_v31 = vld [vmem:[%s1470_s17 + $0x158] sm:$0xff]  ;;  %v1327_v32 = vld [vmem:[%s1470_s17 + $0x160] sm:$0xff]  ;;  %v255_v33 = vmax.f32 %v201_v18, %v242_v24 }
  0x16   : > { %v203_v28 = vmax.f32 %v176_v20, %v1300_v25  ;;  %269 = vst.msk [vmem:[#allocation2 + $0x10] sm:$0xff] %vm266_vm0, %v253_v22  ;;  %v244_v34 = vmax.f32 %v1313_v27, %v1326_v31  ;;  %v245_v35 = vmax.f32 %v1314_v30, %v1327_v32  ;;  %v178_v36 = vld [vmem:[%s1470_s17 + $0x30] sm:$0xff]  ;;  %v1302_v37 = vld [vmem:[%s1470_s17 + $0x98] sm:$0xff]  ;;  %v1315_v38 = vld [vmem:[%s1470_s17 + $0x100] sm:$0xff] }
  0x17   : > { %364 = vrot.lane.b32.xlu0 %v338_v12, %s1422_s18  ;;  %270 = vst.msk [vmem:[#allocation2 + $0x18] sm:$0xff] %vm266_vm0, %v254_v23  ;;  %v205_v39 = vmax.f32 %v178_v36, %v1302_v37  ;;  %v1328_v40 = vld [vmem:[%s1470_s17 + $0x168] sm:$0xff]  ;;  %v179_v41 = vld [vmem:[%s1470_s17 + $0x38] sm:$0xff]  ;;  %v180_v42 = vld [vmem:[%s1470_s17 + $0x40] sm:$0xff] }
  0x18   : > { %271 = vst.msk [vmem:[#allocation2 + $0x20] sm:$0xff] %vm266_vm0, %v255_v33  ;;  %v257_v43 = vmax.f32 %v203_v28, %v244_v34  ;;  %v258_v44 = vmax.f32 %v204_v29, %v245_v35  ;;  %v246_v45 = vmax.f32 %v1315_v38, %v1328_v40  ;;  %v1303_v46 = vld [vmem:[%s1470_s17 + $0xa0] sm:$0xff]  ;;  %v1304_v47 = vld [vmem:[%s1470_s17 + $0xa8] sm:$0xff]  ;;  %v1317_v51 = vld [vmem:[%s1470_s17 + $0x110] sm:$0xff] }
  0x19   : > { %v1316_v48 = vld [vmem:[%s1470_s17 + $0x108] sm:$0xff]  ;;  %v206_v49 = vmax.f32 %v179_v41, %v1303_v46  ;;  %v207_v50 = vmax.f32 %v180_v42, %v1304_v47  ;;  %v1329_v52 = vld [vmem:[%s1470_s17 + $0x170] sm:$0xff]  ;;  %v1330_v53 = vld [vmem:[%s1470_s17 + $0x178] sm:$0xff] }
  0x1a   : > { %273 = vst.msk [vmem:[#allocation2 + $0x30] sm:$0xff] %vm266_vm0, %v257_v43  ;;  %v259_v54 = vmax.f32 %v205_v39, %v246_v45  ;;  %v247_v55 = vmax.f32 %v1316_v48, %v1329_v52  ;;  %v248_v56 = vmax.f32 %v1317_v51, %v1330_v53  ;;  %v175_v57 = vld [vmem:[%s1470_s17 + $0x18] sm:$0xff]  ;;  %v1299_v58 = vld [vmem:[%s1470_s17 + $0x80] sm:$0xff]  ;;  %v1312_v59 = vld [vmem:[%s1470_s17 + $0xe8] sm:$0xff] }
  0x1b   : > { %274 = vst.msk [vmem:[#allocation2 + $0x38] sm:$0xff] %vm266_vm0, %v258_v44  ;;  %v202_v60 = vmax.f32 %v175_v57, %v1299_v58  ;;  %v1325_v61 = vld [vmem:[%s1470_s17 + $0x150] sm:$0xff]  ;;  %v181_v62 = vld [vmem:[%s1470_s17 + $0x48] sm:$0xff]  ;;  %v1318_v5 = vld [vmem:[%s1470_s17 + $0x118] sm:$0xff] }
  0x1c   : > { %v1305_v63 = vld [vmem:[%s1470_s17 + $0xb0] sm:$0xff]  ;;  %275 = vst.msk [vmem:[#allocation2 + $0x40] sm:$0xff] %vm266_vm0, %v259_v54  ;;  %v260_v1 = vmax.f32 %v206_v49, %v247_v55  ;;  %v261_v2 = vmax.f32 %v207_v50, %v248_v56  ;;  %v243_v3 = vmax.f32 %v1312_v59, %v1325_v61  ;;  %v1331_v6 = vld [vmem:[%s1470_s17 + $0x180] sm:$0xff]  ;;  %v183_v10 = vld [vmem:[%s1470_s17 + $0x58] sm:$0xff] }
  0x1d   : > { %v208_v4 = vmax.f32 %v181_v62, %v1305_v63  ;;  %v182_v7 = vld [vmem:[%s1470_s17 + $0x50] sm:$0xff]  ;;  %v249_v9 = vmax.f32 %v1318_v5, %v1331_v6  ;;  %v1306_v11 = vld [vmem:[%s1470_s17 + $0xb8] sm:$0xff]  ;;  %v1307_v15 = vld [vmem:[%s1470_s17 + $0xc0] sm:$0xff] }
  0x1e   : > { %v326_v8 = vld [vmem:[#allocation2 + $0xe] sm:$0xff]  ;;  %v327_v12 = vld [vmem:[#allocation2 + $0x16] sm:$0xff]  ;;  %276 = vst.msk [vmem:[#allocation2 + $0x48] sm:$0xff] %vm266_vm0, %v260_v1  ;;  %v256_v14 = vmax.f32 %v202_v60, %v243_v3  ;;  %v209_v16 = vmax.f32 %v182_v7, %v1306_v11  ;;  %v1319_v17 = vld [vmem:[%s1470_s17 + $0x120] sm:$0xff]  ;;  %v210_v20 = vmax.f32 %v183_v10, %v1307_v15 }
  0x1f   : > { %v339_v13 = vpack.c.bf16 %v326_v8, %v326_v8  ;;  %v340_v18 = vpack.c.bf16 %v327_v12, %v327_v12  ;;  %277 = vst.msk [vmem:[#allocation2 + $0x50] sm:$0xff] %vm266_vm0, %v261_v2  ;;  %v262_v19 = vmax.f32 %v208_v4, %v249_v9  ;;  %v1320_v21 = vld [vmem:[%s1470_s17 + $0x128] sm:$0xff]  ;;  %v1333_v23 = vld [vmem:[%s1470_s17 + $0x190] sm:$0xff]  ;;  %v328_v26 = vld [vmem:[#allocation2 + $0x1e] sm:$0xff] }
  0x20   : > { %v1332_v22 = vld [vmem:[%s1470_s17 + $0x188] sm:$0xff]  ;;  %272 = vst.msk [vmem:[#allocation2 + $0x28] sm:$0xff] %vm266_vm0, %v256_v14  ;;  %v251_v25 = vmax.f32 %v1320_v21, %v1333_v23  ;;  %v341_v31 = vpack.c.bf16 %v328_v26, %v328_v26  ;;  %v420_v46 = vld [vmem:[#allocation2 + $0x17] sm:$0xff]  ;;  %v421_v53 = vld [vmem:[#allocation2 + $0x1f] sm:$0xff] }
  0x21   : > { %366 = vrot.lane.b32.xlu0 %v339_v13, %s1422_s18  ;;  %v250_v24 = vmax.f32 %v1319_v17, %v1332_v22  ;;  %368 = vrot.lane.b32.xlu1 %v340_v18, %s1422_s18  ;;  %278 = vst.msk [vmem:[#allocation2 + $0x58] sm:$0xff] %vm266_vm0, %v262_v19  ;;  %v418_v47 = vld [vmem:[#allocation2 + $0x7] sm:$0xff]  ;;  %v433_v49 = vpack.c.bf16 %v420_v46, %v420_v46  ;;  %v419_v54 = vld [vmem:[#allocation2 + $0xf] sm:$0xff]  ;;  %v184_v18 = vld [vmem:[%s1470_s17 + $0x60] sm:$0xf] }
  0x22   : > { %v331_v27 = vld [vmem:[#allocation2 + $0x36] sm:$0xff]  ;;  %v264_v29 = vmax.f32 %v210_v20, %v251_v25  ;;  %v431_v50 = vpack.c.bf16 %v418_v47, %v418_v47  ;;  %v434_v56 = vpack.c.bf16 %v421_v53, %v421_v53  ;;  %v432_v57 = vpack.c.bf16 %v419_v54, %v419_v54  ;;  %v285_v11 = vld [vmem:[#allocation2 + $0x5] sm:$0xff]  ;;  %v1321_v20 = vld [vmem:[%s1470_s17 + $0x130] sm:$0xf] }
  0x23   : > { %v263_v28 = vmax.f32 %v209_v16, %v250_v24  ;;  %v344_v30 = vpack.c.bf16 %v331_v27, %v331_v27  ;;  %v332_v35 = vld [vmem:[#allocation2 + $0x3e] sm:$0xff]  ;;  %v298_v12 = vpack.c.bf16 %v285_v11, %v285_v11  ;;  %v287_v13 = vld [vmem:[#allocation2 + $0x15] sm:$0xff]  ;;  %v1308_v19 = vld [vmem:[%s1470_s17 + $0xc8] sm:$0xf] }
  0x24   : > { %280 = vst.msk [vmem:[#allocation2 + $0x68] sm:$0xff] %vm266_vm0, %v264_v29  ;;  %v345_v38 = vpack.c.bf16 %v332_v35, %v332_v35  ;;  %v424_v59 = vld [vmem:[#allocation2 + $0x37] sm:$0xff]  ;;  %v425_v3 = vld [vmem:[#allocation2 + $0x3f] sm:$0xff]  ;;  %v300_v16 = vpack.c.bf16 %v287_v13, %v287_v13  ;;  %v211_v21 = vmax.f32 %v184_v18, %v1308_v19  ;;  %v286_v23 = vld [vmem:[#allocation2 + $0xd] sm:$0xff] }
  0x25   : > { %279 = vst.msk [vmem:[#allocation2 + $0x60] sm:$0xff] %vm266_vm0, %v263_v28  ;;  %v333_v42 = vld [vmem:[#allocation2 + $0x46] sm:$0xff]  ;;  %v437_v62 = vpack.c.bf16 %v424_v59, %v424_v59  ;;  %v438_v6 = vpack.c.bf16 %v425_v3, %v425_v3  ;;  %v1334_v0 = vld [vmem:[%s1470_s17 + $0x198] sm:$0xf]  ;;  %v299_v25 = vpack.c.bf16 %v286_v23, %v286_v23  ;;  %v288_v27 = vld [vmem:[#allocation2 + $0x1d] sm:$0xff]  ;;  %vm695_vm0 = vcmask 156800  }
  0x26   : > { %v334_v34 = vld [vmem:[#allocation2 + $0x4e] sm:$0xff]  ;;  %v346_v45 = vpack.c.bf16 %v333_v42, %v333_v42  ;;  %311 = vst.msk [vmem:[#allocation3] sm:$0xf] %vm281_vm1, %v298_v12  ;;  %v252_v24 = vmax.f32 %v1321_v20, %v1334_v0  ;;  %v698_v3 = vld [vmem:[#allocation2 + $0x19] sm:$0xff] }
  0x27   : > { %v329_v32 = vld [vmem:[#allocation2 + $0x26] sm:$0xff]  ;;  %v330_v36 = vld [vmem:[#allocation2 + $0x2e] sm:$0xff]  ;;  %v347_v37 = vpack.c.bf16 %v334_v34, %v334_v34  ;;  %313 = vst.msk [vmem:[#allocation3 + $0x8] sm:$0xf] %vm281_vm1, %v300_v16 }
  0x28   : > { %v342_v33 = vpack.c.bf16 %v329_v32, %v329_v32  ;;  %v343_v39 = vpack.c.bf16 %v330_v36, %v330_v36  ;;  %v335_v41 = vld [vmem:[#allocation2 + $0x56] sm:$0xff]  ;;  %v426_v58 = vld [vmem:[#allocation2 + $0x47] sm:$0xff]  ;;  %v265_v26 = vmax.f32 %v211_v21, %v252_v24  ;;  %312 = vst.msk [vmem:[#allocation3 + $0x4] sm:$0xf] %vm281_vm1, %v299_v25 }
  0x29   : > { %376 = vrot.lane.b32.xlu0 %v344_v30, %s1422_s18  ;;  %370 = vrot.lane.b32.xlu1 %v341_v31, %s1422_s18  ;;  %v348_v44 = vpack.c.bf16 %v335_v41, %v335_v41  ;;  %v423_v52 = vld [vmem:[#allocation2 + $0x2f] sm:$0xff]  ;;  %v422_v60 = vld [vmem:[#allocation2 + $0x27] sm:$0xff]  ;;  %v439_v61 = vpack.c.bf16 %v426_v58, %v426_v58  ;;  %v428_v8 = vld [vmem:[#allocation2 + $0x57] sm:$0xff]  ;;  %v301_v30 = vpack.c.bf16 %v288_v27, %v288_v27 }
  0x2a   : > { %372 = vrot.lane.b32.xlu2 %v342_v33, %s1422_s18  ;;  %v436_v55 = vpack.c.bf16 %v423_v52, %v423_v52  ;;  %v435_v63 = vpack.c.bf16 %v422_v60, %v422_v60  ;;  %v427_v2 = vld [vmem:[#allocation2 + $0x4f] sm:$0xff]  ;;  %v1559_v10 = vpack.c.bf16 %v428_v8, %v428_v8  ;;  %v289_v15 = vld [vmem:[#allocation2 + $0x25] sm:$0xff]  ;;  %282 = vst.msk [vmem:[#allocation2 + $0x70] sm:$0xf] %vm281_vm1, %v265_v26  ;;  %v605_v41 = vld [vmem:[#allocation2 + $0x18] sm:$0xff] }
  0x2b   : > { %v440_v5 = vpack.c.bf16 %v427_v2, %v427_v2  ;;  %v302_v17 = vpack.c.bf16 %v289_v15, %v289_v15  ;;  %v604_v28 = vld [vmem:[#allocation2 + $0x10] sm:$0xff]  ;;  %314 = vst.msk [vmem:[#allocation3 + $0xc] sm:$0xf] %vm281_vm1, %v301_v30  ;;  %v618_v47 = vpack.c.bf16 %v605_v41, %v605_v41  ;;  %v795_v16 = vld [vmem:[#allocation2 + $0x41] sm:$0xff] }
  0x2c   : > { %v337_v40 = vld [vmem:[#allocation2 + $0x66] sm:$0xf]  ;;  %v336_v48 = vld [vmem:[#allocation2 + $0x5e] sm:$0xff]  ;;  %v290_v29 = vld [vmem:[#allocation2 + $0x2d] sm:$0xff]  ;;  %v617_v33 = vpack.c.bf16 %v604_v28, %v604_v28  ;;  %v1626_v21 = vpack.c.bf16 %v795_v16, %v795_v16 }
  0x2d   : > { %v350_v43 = vpack.c.bf16 %v337_v40, %v337_v40  ;;  %v349_v51 = vpack.c.bf16 %v336_v48, %v336_v48  ;;  %v429_v1 = vld [vmem:[#allocation2 + $0x5f] sm:$0xff]  ;;  %v430_v7 = vld [vmem:[#allocation2 + $0x67] sm:$0xf]  ;;  %315 = vst.msk [vmem:[#allocation3 + $0x10] sm:$0xf] %vm281_vm1, %v302_v17  ;;  %v303_v32 = vpack.c.bf16 %v290_v29, %v290_v29  ;;  %v291_v34 = vld [vmem:[#allocation2 + $0x35] sm:$0xff] }
  0x2e   : > { %v1553_v4 = vpack.c.bf16 %v429_v1, %v429_v1  ;;  %v443_v9 = vpack.c.bf16 %v430_v7, %v430_v7  ;;  %v522_v14 = vld [vmem:[#allocation2 + $0x67] sm:$0xff]  ;;  %v304_v36 = vpack.c.bf16 %v291_v34, %v291_v34  ;;  %v697_v52 = vld [vmem:[#allocation2 + $0x11] sm:$0xff]  ;;  %v296_v53 = vld [vmem:[#allocation2 + $0x5d] sm:$0xff]  ;;  %v711_v7 = vpack.c.bf16 %v698_v3, %v698_v3 }
  0x2f   : > { %v535_v22 = vpack.c.bf16 %v522_v14, %v522_v14  ;;  %v614_v31 = vld [vmem:[#allocation2 + $0x60] sm:$0xff]  ;;  %316 = vst.msk [vmem:[#allocation3 + $0x14] sm:$0xf] %vm281_vm1, %v303_v32  ;;  %v294_v46 = vld [vmem:[#allocation2 + $0x4d] sm:$0xff]  ;;  %v710_v58 = vpack.c.bf16 %v697_v52, %v697_v52 }
  0x30   : > { %v627_v35 = vpack.c.bf16 %v614_v31, %v614_v31  ;;  %317 = vst.msk [vmem:[#allocation3 + $0x18] sm:$0xf] %vm281_vm1, %v304_v36  ;;  %v307_v48 = vpack.c.bf16 %v294_v46, %v294_v46  ;;  %v297_v60 = vld [vmem:[#allocation2 + $0x65] sm:$0xf]  ;;  %v702_v1 = vld [vmem:[#allocation2 + $0x39] sm:$0xff]  ;;  %v701_v13 = vld [vmem:[#allocation2 + $0x31] sm:$0xff] }
  0x31   : > { %382 = vrot.lane.b32.xlu0 %v347_v37, %s1422_s18  ;;  %378 = vrot.lane.b32.xlu1 %v345_v38, %s1422_s18  ;;  %v292_v37 = vld [vmem:[#allocation2 + $0x3d] sm:$0xff]  ;;  %v800_v8 = vld [vmem:[#allocation2 + $0x69] sm:$0xff]  ;;  %v1618_v15 = vpack.c.bf16 %v701_v13, %v701_v13  ;;  %v801_v20 = vld [vmem:[#allocation2 + $0x71] sm:$0xff] }
  0x32   : > { %374 = vrot.lane.b32.xlu2 %v343_v39, %s1422_s18  ;;  %v609_v38 = vld [vmem:[#allocation2 + $0x38] sm:$0xff]  ;;  %v293_v39 = vld [vmem:[#allocation2 + $0x45] sm:$0xff]  ;;  %v305_v40 = vpack.c.bf16 %v292_v37, %v292_v37  ;;  %320 = vst.msk [vmem:[#allocation3 + $0x24] sm:$0xf] %vm281_vm1, %v307_v48  ;;  %v814_v23 = vpack.c.bf16 %v801_v20, %v801_v20  ;;  %v523_v3 = vld [vmem:[#allocation2 + $0x6f] sm:$0xf] }
  0x33   : > { %v306_v42 = vpack.c.bf16 %v293_v39, %v293_v39  ;;  %v791_v18 = vld [vmem:[#allocation2 + $0x21] sm:$0xff]  ;;  %v893_v26 = vld [vmem:[#allocation2 + $0x6a] sm:$0xff] }
  0x34   : > { %318 = vst.msk [vmem:[#allocation3 + $0x1c] sm:$0xf] %vm281_vm1, %v305_v40  ;;  %v883_v24 = vld [vmem:[#allocation2 + $0x1a] sm:$0xff]  ;;  %v906_v30 = vpack.c.bf16 %v893_v26, %v893_v26  ;;  %v888_v31 = vld [vmem:[#allocation2 + $0x42] sm:$0xff]  ;;  %v709_v20 = vld [vmem:[#allocation2 + $0x71] sm:$0xf] }
  0x35   : > { %319 = vst.msk [vmem:[#allocation3 + $0x20] sm:$0xf] %vm281_vm1, %v306_v42  ;;  %v896_v28 = vpack.c.bf16 %v883_v24, %v883_v24  ;;  %v901_v36 = vpack.c.bf16 %v888_v31, %v888_v31  ;;  %v976_v40 = vld [vmem:[#allocation2 + $0x1b] sm:$0xff]  ;;  %v986_v42 = vld [vmem:[#allocation2 + $0x6b] sm:$0xff] }
  0x39   : > { %388 = vrot.lane.b32.xlu0 %v350_v43, %s1422_s18  ;;  %384 = vrot.lane.b32.xlu1 %v348_v44, %s1422_s18  ;;  %v615_v43 = vld [vmem:[#allocation2 + $0x68] sm:$0xff]  ;;  %v622_v44 = vpack.c.bf16 %v609_v38, %v609_v38 }
  0x3a   : > { %380 = vrot.lane.b32.xlu2 %v346_v45, %s1422_s18 }
  0x41   : > { %461 = vrot.lane.b32.xlu0 %v433_v49, %s1423_s19  ;;  %457 = vrot.lane.b32.xlu1 %v431_v50, %s1423_s19  ;;  %v628_v50 = vpack.c.bf16 %v615_v43, %v615_v43 }
  0x42   : > { %386 = vrot.lane.b32.xlu2 %v349_v51, %s1422_s18  ;;  %v295_v51 = vld [vmem:[#allocation2 + $0x55] sm:$0xff] }
  0x43   : > { %v308_v54 = vpack.c.bf16 %v295_v51, %v295_v51  ;;  %v977_v51 = vld [vmem:[#allocation2 + $0x23] sm:$0xff] }
  0x45   : > { %321 = vst.msk [vmem:[#allocation3 + $0x28] sm:$0xf] %vm281_vm1, %v308_v54 }
  0x49   : > { %467 = vrot.lane.b32.xlu0 %v436_v55, %s1423_s19  ;;  %463 = vrot.lane.b32.xlu1 %v434_v56, %s1423_s19 }
  0x4a   : > { %459 = vrot.lane.b32.xlu2 %v432_v57, %s1423_s19 }
  0x51   : > { %473 = vrot.lane.b32.xlu0 %v439_v61, %s1423_s19  ;;  %469 = vrot.lane.b32.xlu1 %v437_v62, %s1423_s19 }
  0x52   : > { %465 = vrot.lane.b32.xlu2 %v435_v63, %s1423_s19 }
  0x59   : > { %479 = vrot.lane.b32.xlu0 %v1553_v4, %s1423_s19  ;;  %475 = vrot.lane.b32.xlu1 %v440_v5, %s1423_s19 }
  0x5a   : > { %471 = vrot.lane.b32.xlu2 %v438_v6, %s1423_s19 }
  0x61   : > { %552 = vrot.lane.b32.xlu0 %v433_v49, %s1424_s20  ;;  %481 = vrot.lane.b32.xlu1 %v443_v9, %s1423_s19  ;;  %v813_v9 = vpack.c.bf16 %v800_v8, %v800_v8  ;;  %v536_v8 = vpack.c.bf16 %v523_v3, %v523_v3 }
  0x62   : > { %477 = vrot.lane.b32.xlu2 %v1559_v10, %s1423_s19 }
  0x69   : > { %558 = vrot.lane.b32.xlu0 %v436_v55, %s1424_s20  ;;  %554 = vrot.lane.b32.xlu1 %v434_v56, %s1424_s20  ;;  %v707_v55 = vld [vmem:[#allocation2 + $0x61] sm:$0xff]  ;;  %v309_v56 = vpack.c.bf16 %v296_v53, %v296_v53  ;;  %v987_v53 = vld [vmem:[#allocation2 + $0x73] sm:$0xff] }
  0x6a   : > { %550 = vrot.lane.b32.xlu2 %v432_v57, %s1424_s20  ;;  %v608_v57 = vld [vmem:[#allocation2 + $0x30] sm:$0xff] }
  0x6b   : > { %322 = vst.msk [vmem:[#allocation3 + $0x2c] sm:$0xf] %vm281_vm1, %v309_v56  ;;  %v990_v56 = vpack.c.bf16 %v977_v51, %v977_v51  ;;  %vm788_vm1 = vcmask 189600  }
  0x71   : > { %564 = vrot.lane.b32.xlu0 %v439_v61, %s1424_s20  ;;  %560 = vrot.lane.b32.xlu1 %v437_v62, %s1424_s20  ;;  %v1602_v61 = vpack.c.bf16 %v707_v55, %v707_v55  ;;  %v310_v62 = vpack.c.bf16 %v297_v60, %v297_v60 }
  0x72   : > { %556 = vrot.lane.b32.xlu2 %v435_v63, %s1424_s20  ;;  %v621_v63 = vpack.c.bf16 %v608_v57, %v608_v57  ;;  %v1000_v57 = vpack.c.bf16 %v987_v53, %v987_v53 }
  0x73   : > { %324 = vst.msk [vmem:[#allocation3 + $0x30] sm:$0x3] %vm323_vm3, %v310_v62  ;;  %v980_v62 = vld [vmem:[#allocation2 + $0x3b] sm:$0xff]  ;;  %vm974_vm3 = vcmask 255200  }
  0x79   : > { %572 = vrot.lane.b32.xlu0 %v535_v22, %s1424_s20  ;;  %566 = vrot.lane.b32.xlu1 %v440_v5, %s1424_s20  ;;  %v715_v5 = vpack.c.bf16 %v702_v1, %v702_v1  ;;  %v1628_v22 = vpack.c.bf16 %v791_v18, %v791_v18 }
  0x7a   : > { %562 = vrot.lane.b32.xlu2 %v438_v6, %s1424_s20 }
  0x81   : > { %643 = vrot.lane.b32.xlu0 %v617_v33, %s1425_s21  ;;  %663 = vrot.lane.b32.xlu1 %v627_v35, %s1425_s21  ;;  %v884_v33 = vld [vmem:[#allocation2 + $0x22] sm:$0xff]  ;;  %v894_v35 = vld [vmem:[#allocation2 + $0x72] sm:$0xff] }
  0x82   : > { %570 = vrot.lane.b32.xlu2 %v1553_v4, %s1424_s20  ;;  %v897_v38 = vpack.c.bf16 %v884_v33, %v884_v33  ;;  %v907_v39 = vpack.c.bf16 %v894_v35, %v894_v35 }
  0x84   : > { %v373_v45 = vpop.permute.xlu2 %372 }
  0x85   : > { %408 = vst.msk [vmem:[#allocation3 + $0x10] sm:$0xf] %vm403_vm2, %v373_v45  ;;  %v989_v45 = vpack.c.bf16 %v976_v40, %v976_v40  ;;  %v985_v40 = vld [vmem:[#allocation2 + $0x63] sm:$0xff] }
  0x89   : > { %v365_v49 = vpop.permute.xlu0 %364  ;;  %653 = vrot.lane.b32.xlu0 %v622_v44, %s1425_s21  ;;  %645 = vrot.lane.b32.xlu1 %v618_v47, %s1425_s21  ;;  %v887_v44 = vld [vmem:[#allocation2 + $0x3a] sm:$0xff]  ;;  %v999_v47 = vpack.c.bf16 %v986_v42, %v986_v42 }
  0x8a   : > { %404 = vst.msk [vmem:[#allocation3] sm:$0xf] %vm403_vm2, %v365_v49  ;;  %665 = vrot.lane.b32.xlu2 %v628_v50, %s1425_s21  ;;  %v900_v48 = vpack.c.bf16 %v887_v44, %v887_v44  ;;  %v981_v49 = vld [vmem:[#allocation2 + $0x43] sm:$0xff]  ;;  %v998_v44 = vpack.c.bf16 %v985_v40, %v985_v40 }
  0x8b   : > { %v994_v54 = vpack.c.bf16 %v981_v49, %v981_v49 }
  0x8c   : > { %v375_v59 = vpop.permute.xlu2 %374 }
  0x8d   : > { %409 = vst.msk [vmem:[#allocation3 + $0x14] sm:$0xf] %vm403_vm2, %v375_v59 }
  0x91   : > { %736 = vrot.lane.b32.xlu0 %v710_v58, %s1426_s22  ;;  %756 = vrot.lane.b32.xlu1 %v1602_v61, %s1426_s22  ;;  %v613_v58 = vld [vmem:[#allocation2 + $0x58] sm:$0xff] }
  0x92   : > { %651 = vrot.lane.b32.xlu2 %v621_v63, %s1425_s21  ;;  %v626_v63 = vpack.c.bf16 %v613_v58, %v613_v58 }
  0x93   : > { %v367_v2 = vpop.permute.xlu0 %366  ;;  %v369_v4 = vpop.permute.xlu1 %368 }
  0x94   : > { %405 = vst.msk [vmem:[#allocation3 + $0x4] sm:$0xf] %vm403_vm2, %v367_v2  ;;  %v381_v6 = vpop.permute.xlu2 %380  ;;  %v993_v2 = vpack.c.bf16 %v980_v62, %v980_v62  ;;  %v988_v62 = vld [vmem:[#allocation2 + $0x7b] sm:$0xf] }
  0x95   : > { %406 = vst.msk [vmem:[#allocation3 + $0x8] sm:$0xf] %vm403_vm2, %v369_v4  ;;  %v1001_v3 = vpack.c.bf16 %v988_v62, %v988_v62 }
  0x96   : > { %412 = vst.msk [vmem:[#allocation3 + $0x20] sm:$0xf] %vm403_vm2, %v381_v6 }
  0x99   : > { %746 = vrot.lane.b32.xlu0 %v715_v5, %s1426_s22  ;;  %738 = vrot.lane.b32.xlu1 %v711_v7, %s1426_s22 }
  0x9a   : > { %758 = vrot.lane.b32.xlu2 %v813_v9, %s1426_s22 }
  0x9b   : > { %v377_v11 = vpop.permute.xlu0 %376  ;;  %v371_v12 = vpop.permute.xlu1 %370 }
  0x9c   : > { %410 = vst.msk [vmem:[#allocation3 + $0x18] sm:$0xf] %vm403_vm2, %v377_v11  ;;  %v387_v14 = vpop.permute.xlu2 %386 }
  0x9d   : > { %407 = vst.msk [vmem:[#allocation3 + $0xc] sm:$0xf] %vm403_vm2, %v371_v12 }
  0x9e   : > { %415 = vst.msk [vmem:[#allocation3 + $0x2c] sm:$0xf] %vm403_vm2, %v387_v14  ;;  %v798_v14 = vld [vmem:[#allocation2 + $0x59] sm:$0xff] }
  0xa1   : > { %829 = vrot.lane.b32.xlu0 %v711_v7, %s1427_s23  ;;  %849 = vrot.lane.b32.xlu1 %v813_v9, %s1427_s23  ;;  %v612_v7 = vld [vmem:[#allocation2 + $0x50] sm:$0xff] }
  0xa2   : > { %744 = vrot.lane.b32.xlu2 %v1618_v15, %s1426_s22  ;;  %v625_v12 = vpack.c.bf16 %v612_v7, %v612_v7 }
  0xa3   : > { %v383_v17 = vpop.permute.xlu0 %382  ;;  %v379_v19 = vpop.permute.xlu1 %378 }
  0xa4   : > { %413 = vst.msk [vmem:[#allocation3 + $0x24] sm:$0xf] %vm403_vm2, %v383_v17  ;;  %v460_v0 = vpop.permute.xlu2 %459 }
  0xa5   : > { %411 = vst.msk [vmem:[#allocation3 + $0x1c] sm:$0xf] %vm403_vm2, %v379_v19  ;;  %v811_v19 = vpack.c.bf16 %v798_v14, %v798_v14 }
  0xa6   : > { %498 = vst.msk [vmem:[#allocation3 + $0x4] sm:$0xf] %vm496_vm4, %v460_v0 }
  0xa9   : > { %839 = vrot.lane.b32.xlu0 %v1626_v21, %s1427_s23  ;;  %831 = vrot.lane.b32.xlu1 %v1628_v22, %s1427_s23 }
  0xaa   : > { %851 = vrot.lane.b32.xlu2 %v814_v23, %s1427_s23  ;;  %v891_v23 = vld [vmem:[#allocation2 + $0x5a] sm:$0xff] }
  0xab   : > { %v389_v25 = vpop.permute.xlu0 %388  ;;  %v385_v27 = vpop.permute.xlu1 %384 }
  0xac   : > { %417 = vst.msk [vmem:[#allocation3 + $0x30] sm:$0x3] %vm416_vm5, %v389_v25  ;;  %v466_v29 = vpop.permute.xlu2 %465  ;;  %v722_v25 = vpack.c.bf16 %v709_v20, %v709_v20 }
  0xad   : > { %414 = vst.msk [vmem:[#allocation3 + $0x28] sm:$0xf] %vm403_vm2, %v385_v27  ;;  %v904_v27 = vpack.c.bf16 %v891_v23, %v891_v23  ;;  %vm881_vm2 = vcmask 222400  }
  0xae   : > { %501 = vst.msk [vmem:[#allocation3 + $0x10] sm:$0xf] %vm496_vm4, %v466_v29 }
  0xb1   : > { %922 = vrot.lane.b32.xlu0 %v896_v28, %s1428_s24  ;;  %942 = vrot.lane.b32.xlu1 %v906_v30, %s1428_s24  ;;  %v802_v28 = vld [vmem:[#allocation2 + $0x79] sm:$0xf] }
  0xb2   : > { %837 = vrot.lane.b32.xlu2 %v715_v5, %s1427_s23  ;;  %v705_v5 = vld [vmem:[#allocation2 + $0x51] sm:$0xff]  ;;  %v984_v30 = vld [vmem:[#allocation2 + $0x5b] sm:$0xff]  ;;  %v815_v33 = vpack.c.bf16 %v802_v28, %v802_v28 }
  0xb3   : > { %v462_v32 = vpop.permute.xlu0 %461  ;;  %v458_v34 = vpop.permute.xlu1 %457  ;;  %v1667_v11 = vpack.c.bf16 %v705_v5, %v705_v5  ;;  %v997_v35 = vpack.c.bf16 %v984_v30, %v984_v30 }
  0xb4   : > { %499 = vst.msk [vmem:[#allocation3 + $0x8] sm:$0xf] %vm496_vm4, %v462_v32  ;;  %v472_v37 = vpop.permute.xlu2 %471  ;;  %v892_v32 = vld [vmem:[#allocation2 + $0x62] sm:$0xff] }
  0xb5   : > { %497 = vst.msk [vmem:[#allocation3] sm:$0xf] %vm496_vm4, %v458_v34 }
  0xb6   : > { %504 = vst.msk [vmem:[#allocation3 + $0x1c] sm:$0xf] %vm496_vm4, %v472_v37 }
  0xb9   : > { %932 = vrot.lane.b32.xlu0 %v901_v36, %s1428_s24  ;;  %924 = vrot.lane.b32.xlu1 %v897_v38, %s1428_s24  ;;  %v905_v36 = vpack.c.bf16 %v892_v32, %v892_v32  ;;  %v606_v38 = vld [vmem:[#allocation2 + $0x20] sm:$0xff]  ;;  %v983_v32 = vld [vmem:[#allocation2 + $0x53] sm:$0xff] }
  0xba   : > { %944 = vrot.lane.b32.xlu2 %v907_v39, %s1428_s24 }
  0xbb   : > { %v468_v41 = vpop.permute.xlu0 %467  ;;  %v464_v43 = vpop.permute.xlu1 %463 }
  0xbc   : > { %502 = vst.msk [vmem:[#allocation3 + $0x14] sm:$0xf] %vm496_vm4, %v468_v41  ;;  %v478_v46 = vpop.permute.xlu2 %477 }
  0xbd   : > { %500 = vst.msk [vmem:[#allocation3 + $0xc] sm:$0xf] %vm496_vm4, %v464_v43  ;;  %v619_v43 = vpack.c.bf16 %v606_v38, %v606_v38 }
  0xbe   : > { %507 = vst.msk [vmem:[#allocation3 + $0x28] sm:$0xf] %vm496_vm4, %v478_v46  ;;  %v611_v46 = vld [vmem:[#allocation2 + $0x48] sm:$0xff] }
  0xc1   : > { %1015 = vrot.lane.b32.xlu0 %v989_v45, %s1429_s25  ;;  %1035 = vrot.lane.b32.xlu1 %v999_v47, %s1429_s25 }
  0xc2   : > { %930 = vrot.lane.b32.xlu2 %v900_v48, %s1428_s24  ;;  %v607_v48 = vld [vmem:[#allocation2 + $0x28] sm:$0xff] }
  0xc3   : > { %v474_v50 = vpop.permute.xlu0 %473  ;;  %v470_v52 = vpop.permute.xlu1 %469  ;;  %v620_v51 = vpack.c.bf16 %v607_v48, %v607_v48 }
  0xc4   : > { %505 = vst.msk [vmem:[#allocation3 + $0x20] sm:$0xf] %vm496_vm4, %v474_v50  ;;  %v551_v55 = vpop.permute.xlu2 %550  ;;  %v624_v50 = vpack.c.bf16 %v611_v46, %v611_v46 }
  0xc5   : > { %503 = vst.msk [vmem:[#allocation3 + $0x18] sm:$0xf] %vm496_vm4, %v470_v52  ;;  %v704_v52 = vld [vmem:[#allocation2 + $0x49] sm:$0xff] }
  0xc6   : > { %590 = vst.msk [vmem:[#allocation3] sm:$0xf] %vm589_vm6, %v551_v55 }
  0xc9   : > { %1025 = vrot.lane.b32.xlu0 %v994_v54, %s1429_s25  ;;  %1017 = vrot.lane.b32.xlu1 %v990_v56, %s1429_s25  ;;  %v700_v54 = vld [vmem:[#allocation2 + $0x29] sm:$0xff]  ;;  %v895_v56 = vld [vmem:[#allocation2 + $0x7a] sm:$0xf] }
  0xca   : > { %1037 = vrot.lane.b32.xlu2 %v1000_v57, %s1429_s25  ;;  %v717_v57 = vpack.c.bf16 %v704_v52, %v704_v52 }
  0xcb   : > { %v480_v59 = vpop.permute.xlu0 %479  ;;  %v476_v60 = vpop.permute.xlu1 %475 }
  0xcc   : > { %508 = vst.msk [vmem:[#allocation3 + $0x2c] sm:$0xf] %vm496_vm4, %v480_v59  ;;  %v557_v1 = vpop.permute.xlu2 %556  ;;  %v713_v59 = vpack.c.bf16 %v700_v54, %v700_v54 }
  0xcd   : > { %506 = vst.msk [vmem:[#allocation3 + $0x24] sm:$0xf] %vm496_vm4, %v476_v60  ;;  %vm1067_vm4 = vcmask 288000  }
  0xce   : > { %593 = vst.msk [vmem:[#allocation3 + $0xc] sm:$0xf] %vm589_vm6, %v557_v1 }
  0xd1   : > { %661 = vrot.lane.b32.xlu0 %v626_v63, %s1425_s21  ;;  %568 = vrot.lane.b32.xlu1 %v1559_v10, %s1424_s20  ;;  %v616_v10 = vld [vmem:[#allocation2 + $0x70] sm:$0xf] }
  0xd2   : > { %1023 = vrot.lane.b32.xlu2 %v993_v2, %s1429_s25  ;;  %v629_v17 = vpack.c.bf16 %v616_v10, %v616_v10  ;;  %v1086_v2 = vld [vmem:[%s1821_s1 + $0x10] sm:$0x3]  ;;  %v1383_v10 = vld [vmem:[%s1821_s1 + $0x8] sm:$0xff] }
  0xd3   : > { %v553_v4 = vpop.permute.xlu0 %552  ;;  %v482_v6 = vpop.permute.xlu1 %481 }
  0xd4   : > { %591 = vst.msk [vmem:[#allocation3 + $0x4] sm:$0xf] %vm589_vm6, %v553_v4  ;;  %v563_v9 = vpop.permute.xlu2 %562  ;;  %v1133_v4 = vunpack.c.l.b16 %v1086_v2 }
  0xd5   : > { %510 = vst.msk [vmem:[#allocation3 + $0x30] sm:$0x3] %vm509_vm7, %v482_v6  ;;  %v885_v6 = vld [vmem:[#allocation2 + $0x2a] sm:$0xff] }
  0xd6   : > { %596 = vst.msk [vmem:[#allocation3 + $0x18] sm:$0xf] %vm589_vm6, %v563_v9  ;;  %v1136_v5 = vpack.c.b16 %v1133_v4, %v1133_v4 }
  0xd8   : > { %v1163_v7 = vsel %vm1161_vm11, %v1136_v5, 0 }
  0xd9   : > { %574 = vrot.lane.b32.xlu0 %v536_v8, %s1424_s20  ;;  %752 = vrot.lane.b32.xlu1 %v1667_v11, %s1426_s22 }
  0xda   : > { %659 = vrot.lane.b32.xlu2 %v625_v12, %s1425_s21  ;;  %1386 = vmatpush.bf16.msra.mxu3 %v1163_v7  ;;  %v898_v12 = vpack.c.bf16 %v885_v6, %v885_v6 }
  0xdb   : > { %v559_v13 = vpop.permute.xlu0 %558  ;;  %v555_v16 = vpop.permute.xlu1 %554  ;;  %1170 = vmatpush.bf16.msra.mxu0 %v1163_v7  ;;  %1384 = vmatpush.bf16.msra.mxu1 %v1163_v7 }
  0xdc   : > { %594 = vst.msk [vmem:[#allocation3 + $0x10] sm:$0xf] %vm589_vm6, %v559_v13  ;;  %v571_v18 = vpop.permute.xlu2 %570  ;;  %1385 = vmatpush.bf16.msra.mxu2 %v1163_v7  ;;  %v890_v13 = vld [vmem:[#allocation2 + $0x52] sm:$0xff] }
  0xdd   : > { %592 = vst.msk [vmem:[#allocation3 + $0x8] sm:$0xf] %vm589_vm6, %v555_v16  ;;  %v886_v16 = vld [vmem:[#allocation2 + $0x32] sm:$0xff] }
  0xde   : > { %600 = vst.msk [vmem:[#allocation3 + $0x28] sm:$0xf] %vm589_vm6, %v571_v18  ;;  %1389 = vmatpush.bf16.msra.mxu3 %v1383_v10  ;;  %v903_v18 = vpack.c.bf16 %v890_v13, %v890_v13  ;;  %v899_v20 = vpack.c.bf16 %v886_v16, %v886_v16 }
  0xdf   : > { %1171 = vmatpush.bf16.msra.mxu0 %v1383_v10  ;;  %1387 = vmatpush.bf16.msra.mxu1 %v1383_v10 }
  0xe0   : > { %1388 = vmatpush.bf16.msra.mxu2 %v1383_v10 }
  0xe1   : > { %667 = vrot.lane.b32.xlu0 %v629_v17, %s1425_s21  ;;  %845 = vrot.lane.b32.xlu1 %v811_v19, %s1427_s23 }
  0xe2   : > { %754 = vrot.lane.b32.xlu2 %v811_v19, %s1426_s22 }
  0xe3   : > { %v565_v0 = vpop.permute.xlu0 %564  ;;  %v561_v24 = vpop.permute.xlu1 %560 }
  0xe4   : > { %597 = vst.msk [vmem:[#allocation3 + $0x1c] sm:$0xf] %vm589_vm6, %v565_v0  ;;  %v666_v26 = vpop.permute.xlu2 %665  ;;  %v982_v0 = vld [vmem:[#allocation2 + $0x4b] sm:$0xff] }
  0xe5   : > { %595 = vst.msk [vmem:[#allocation3 + $0x14] sm:$0xf] %vm589_vm6, %v561_v24  ;;  %v978_v24 = vld [vmem:[#allocation2 + $0x2b] sm:$0xff] }
  0xe9   : > { %760 = vrot.lane.b32.xlu0 %v722_v25, %s1426_s22  ;;  %938 = vrot.lane.b32.xlu1 %v904_v27, %s1428_s24  ;;  %v995_v27 = vpack.c.bf16 %v982_v0, %v982_v0 }
  0xea   : > { %847 = vrot.lane.b32.xlu2 %v1602_v61, %s1427_s23  ;;  %v610_v61 = vld [vmem:[#allocation2 + $0x40] sm:$0xff] }
  0xeb   : > { %v573_v29 = vpop.permute.xlu0 %572  ;;  %v567_v31 = vpop.permute.xlu1 %566  ;;  %v623_v41 = vpack.c.bf16 %v610_v61, %v610_v61 }
  0xec   : > { %601 = vst.msk [vmem:[#allocation3 + $0x2c] sm:$0xf] %vm589_vm6, %v573_v29  ;;  %v652_v34 = vpop.permute.xlu2 %651  ;;  %v991_v29 = vpack.c.bf16 %v978_v24, %v978_v24  ;;  %v1412_v24 = vld [vmem:[%s1822_s2] ss:$0 sm:$0xff] }
  0xed   : > { %598 = vst.msk [vmem:[#allocation3 + $0x20] sm:$0xf] %vm589_vm6, %v567_v31 }
  0xee   : > { %694 = vst.msk [vmem:[#allocation3 + $0x2c] sm:$0xf] %vm682_vm8, %v666_v26  ;;  %v889_v26 = vld [vmem:[#allocation2 + $0x4a] sm:$0xff] }
  0xef   : > { %687 = vst.msk [vmem:[#allocation3 + $0x10] sm:$0xf] %vm682_vm8, %v652_v34  ;;  %v902_v30 = vpack.c.bf16 %v889_v26, %v889_v26 }
  0xf1   : > { %853 = vrot.lane.b32.xlu0 %v815_v33, %s1427_s23  ;;  %1031 = vrot.lane.b32.xlu1 %v997_v35, %s1429_s25  ;;  %v979_v33 = vld [vmem:[#allocation2 + $0x33] sm:$0xff]  ;;  %v996_v35 = vpack.c.bf16 %v983_v32, %v983_v32 }
  0xf2   : > { %940 = vrot.lane.b32.xlu2 %v905_v36, %s1428_s24  ;;  %v992_v36 = vpack.c.bf16 %v979_v33, %v979_v33 }
  0xf3   : > { %v644_v37 = vpop.permute.xlu0 %643  ;;  %v664_v39 = vpop.permute.xlu1 %663 }
  0xf4   : > { %683 = vst.msk [vmem:[#allocation3] sm:$0xf] %vm682_vm8, %v644_v37  ;;  %v759_v42 = vpop.permute.xlu2 %758 }
  0xf5   : > { %693 = vst.msk [vmem:[#allocation3 + $0x28] sm:$0xf] %vm682_vm8, %v664_v39 }
  0xf6   : > { %787 = vst.msk [vmem:[#allocation3 + $0x2c] sm:$0xf] %vm775_vm9, %v759_v42 }
  0xf9   : > { %655 = vrot.lane.b32.xlu0 %v623_v41, %s1425_s21  ;;  %647 = vrot.lane.b32.xlu1 %v619_v43, %s1425_s21 }
  0xfa   : > { %1033 = vrot.lane.b32.xlu2 %v998_v44, %s1429_s25 }
  0xfb   : > { %v654_v45 = vpop.permute.xlu0 %653  ;;  %v646_v47 = vpop.permute.xlu1 %645 }
  0xfc   : > { %688 = vst.msk [vmem:[#allocation3 + $0x14] sm:$0xf] %vm682_vm8, %v654_v45  ;;  %v745_v49 = vpop.permute.xlu2 %744 }
  0xfd   : > { %684 = vst.msk [vmem:[#allocation3 + $0x4] sm:$0xf] %vm682_vm8, %v646_v47 }
  0xfe   : > { %780 = vst.msk [vmem:[#allocation3 + $0x10] sm:$0xf] %vm775_vm9, %v745_v49 }
 0x101   : > { %740 = vrot.lane.b32.xlu0 %v1628_v22, %s1426_s22  ;;  %657 = vrot.lane.b32.xlu1 %v624_v50, %s1425_s21  ;;  %v908_v22 = vpack.c.bf16 %v895_v56, %v895_v56 }
 0x102   : > { %649 = vrot.lane.b32.xlu2 %v620_v51, %s1425_s21 }
 0x103   : > { %v737_v53 = vpop.permute.xlu0 %736  ;;  %v757_v55 = vpop.permute.xlu1 %756 }
 0x104   : > { %776 = vst.msk [vmem:[#allocation3] sm:$0xf] %vm775_vm9, %v737_v53  ;;  %v852_v58 = vpop.permute.xlu2 %851 }
 0x105   : > { %786 = vst.msk [vmem:[#allocation3 + $0x28] sm:$0xf] %vm775_vm9, %v757_v55 }
 0x106   : > { %880 = vst.msk [vmem:[#allocation3 + $0x2c] sm:$0xf] %vm868_vm10, %v852_v58 }
 0x109   : > { %750 = vrot.lane.b32.xlu0 %v717_v57, %s1426_s22  ;;  %742 = vrot.lane.b32.xlu1 %v713_v59, %s1426_s22 }
 0x10a   : > { %946 = vrot.lane.b32.xlu2 %v908_v22, %s1428_s24 }
 0x10b   : > { %v747_v60 = vpop.permute.xlu0 %746  ;;  %v739_v63 = vpop.permute.xlu1 %738 }
 0x10c   : > { %781 = vst.msk [vmem:[#allocation3 + $0x14] sm:$0xf] %vm775_vm9, %v747_v60  ;;  %v838_v1 = vpop.permute.xlu2 %837 }
 0x10d   : > { %777 = vst.msk [vmem:[#allocation3 + $0x4] sm:$0xf] %vm775_vm9, %v739_v63 }
 0x10e   : > { %873 = vst.msk [vmem:[#allocation3 + $0x10] sm:$0xf] %vm868_vm10, %v838_v1 }
 0x111   : > { %835 = vrot.lane.b32.xlu0 %v1618_v15, %s1427_s23  ;;  %1039 = vrot.lane.b32.xlu1 %v1001_v3, %s1429_s25 }
 0x112   : > { %748 = vrot.lane.b32.xlu2 %v1626_v21, %s1426_s22  ;;  %v1382_v21 = vld [vmem:[%s1821_s1] sm:$0xff] }
 0x113   : > { %v830_v8 = vpop.permute.xlu0 %829  ;;  %v850_v9 = vpop.permute.xlu1 %849  ;;  %1392 = vmatpush.bf16.msra.mxu3 %v1382_v21  ;;  %1172 = vmatpush.bf16.msra.mxu0 %v1382_v21 }
 0x114   : > { %869 = vst.msk [vmem:[#allocation3] sm:$0xf] %vm868_vm10, %v830_v8  ;;  %v945_v15 = vpop.permute.xlu2 %944  ;;  %1390 = vmatpush.bf16.msra.mxu1 %v1382_v21  ;;  %1391 = vmatpush.bf16.msra.mxu2 %v1382_v21 }
 0x115   : > { %879 = vst.msk [vmem:[#allocation3 + $0x28] sm:$0xf] %vm868_vm10, %v850_v9 }
 0x116   : > { %973 = vst.msk [vmem:[#allocation3 + $0x2c] sm:$0xf] %vm961_vm12, %v945_v15 }
 0x119   : > { %926 = vrot.lane.b32.xlu0 %v898_v12, %s1428_s24  ;;  %841 = vrot.lane.b32.xlu1 %v717_v57, %s1427_s23 }
 0x11a   : > { %833 = vrot.lane.b32.xlu2 %v713_v59, %s1427_s23 }
 0x11b   : > { %v840_v14 = vpop.permute.xlu0 %839  ;;  %v832_v17 = vpop.permute.xlu1 %831 }
 0x11c   : > { %874 = vst.msk [vmem:[#allocation3 + $0x14] sm:$0xf] %vm868_vm10, %v840_v14  ;;  %v931_v19 = vpop.permute.xlu2 %930 }
 0x11d   : > { %870 = vst.msk [vmem:[#allocation3 + $0x4] sm:$0xf] %vm868_vm10, %v832_v17 }
 0x11e   : > { %966 = vst.msk [vmem:[#allocation3 + $0x10] sm:$0xf] %vm961_vm12, %v931_v19 }
 0x121   : > { %936 = vrot.lane.b32.xlu0 %v903_v18, %s1428_s24  ;;  %928 = vrot.lane.b32.xlu1 %v899_v20, %s1428_s24 }
 0x122   : > { %843 = vrot.lane.b32.xlu2 %v1667_v11, %s1427_s23 }
 0x123   : > { %v923_v23 = vpop.permute.xlu0 %922  ;;  %v943_v25 = vpop.permute.xlu1 %942 }
 0x124   : > { %962 = vst.msk [vmem:[#allocation3] sm:$0xf] %vm961_vm12, %v923_v23  ;;  %v1038_v28 = vpop.permute.xlu2 %1037 }
 0x125   : > { %972 = vst.msk [vmem:[#allocation3 + $0x28] sm:$0xf] %vm961_vm12, %v943_v25 }
 0x126   : > { %1066 = vst.msk [vmem:[#allocation3 + $0x2c] sm:$0xf] %vm1054_vm13, %v1038_v28 }
 0x129   : > { %1027 = vrot.lane.b32.xlu0 %v995_v27, %s1429_s25  ;;  %1019 = vrot.lane.b32.xlu1 %v991_v29, %s1429_s25 }
 0x12a   : > { %934 = vrot.lane.b32.xlu2 %v902_v30, %s1428_s24 }
 0x12b   : > { %v933_v31 = vpop.permute.xlu0 %932  ;;  %v925_v11 = vpop.permute.xlu1 %924 }
 0x12c   : > { %967 = vst.msk [vmem:[#allocation3 + $0x14] sm:$0xf] %vm961_vm12, %v933_v31  ;;  %v1024_v34 = vpop.permute.xlu2 %1023 }
 0x12d   : > { %963 = vst.msk [vmem:[#allocation3 + $0x4] sm:$0xf] %vm961_vm12, %v925_v11 }
 0x12e   : > { %1059 = vst.msk [vmem:[#allocation3 + $0x10] sm:$0xf] %vm1054_vm13, %v1024_v34 }
 0x131   : > { %1029 = vrot.lane.b32.xlu1 %v996_v35, %s1429_s25 }
 0x132   : > { %1021 = vrot.lane.b32.xlu2 %v992_v36, %s1429_s25 }
 0x133   : > { %v1016_v61 = vpop.permute.xlu0 %1015  ;;  %v1036_v37 = vpop.permute.xlu1 %1035 }
 0x134   : > { %1055 = vst.msk [vmem:[#allocation3] sm:$0xf] %vm1054_vm13, %v1016_v61  ;;  %v660_v38 = vpop.permute.xlu2 %659 }
 0x135   : > { %1065 = vst.msk [vmem:[#allocation3 + $0x28] sm:$0xf] %vm1054_vm13, %v1036_v37 }
 0x136   : > { %691 = vst.msk [vmem:[#allocation3 + $0x20] sm:$0xf] %vm682_vm8, %v660_v38 }
 0x13b   : > { %v1026_v39 = vpop.permute.xlu0 %1025  ;;  %v1018_v40 = vpop.permute.xlu1 %1017 }
 0x13c   : > { %1060 = vst.msk [vmem:[#allocation3 + $0x14] sm:$0xf] %vm1054_vm13, %v1026_v39  ;;  %v1381_v41 = vld [vmem:[#allocation3 + $0x28] sm:$0xff]  ;;  %v755_v42 = vpop.permute.xlu2 %754 }
 0x13d   : > { %1056 = vst.msk [vmem:[#allocation3 + $0x4] sm:$0xf] %vm1054_vm13, %v1018_v40  ;;  %1372 = vmatmul.msk.bf16.vlgmr.msra.gmra.mxu3 %vm1139_vm14, %v1381_v41 }
 0x143   : > { %v1378_v43 = vld [vmem:[#allocation3 + $0x10] sm:$0xff]  ;;  %v662_v44 = vpop.permute.xlu0 %661  ;;  %v569_v45 = vpop.permute.xlu1 %568 }
 0x144   : > { %v1376_v46 = vld [vmem:[#allocation3] sm:$0xff]  ;;  %599 = vst.msk [vmem:[#allocation3 + $0x24] sm:$0xf] %vm589_vm6, %v569_v45  ;;  %1369 = vmatmul.msk.bf16.vlgmr.msra.gmra.mxu1 %vm1139_vm14, %v1378_v43  ;;  %v848_v47 = vpop.permute.xlu2 %847 }
 0x145   : > { %1367 = vmatmul.msk.bf16.vlgmr.msra.gmra.mxu0 %vm1139_vm14, %v1376_v46  ;;  %692 = vst.msk [vmem:[#allocation3 + $0x24] sm:$0xf] %vm682_vm8, %v662_v44 }
 0x146   : > { %785 = vst.msk [vmem:[#allocation3 + $0x24] sm:$0xf] %vm775_vm9, %v755_v42 }
 0x147   : > { %878 = vst.msk [vmem:[#allocation3 + $0x24] sm:$0xf] %vm868_vm10, %v848_v47 }
 0x14b   : > { %v575_v48 = vpop.permute.xlu0 %574  ;;  %v753_v49 = vpop.permute.xlu1 %752 }
 0x14c   : > { %603 = vst.msk [vmem:[#allocation3 + $0x30] sm:$0x3] %vm602_vm15, %v575_v48  ;;  %v941_v50 = vpop.permute.xlu2 %940 }
 0x14d   : > { %784 = vst.msk [vmem:[#allocation3 + $0x20] sm:$0xf] %vm775_vm9, %v753_v49 }
 0x14e   : > { %971 = vst.msk [vmem:[#allocation3 + $0x24] sm:$0xf] %vm961_vm12, %v941_v50 }
 0x153   : > { %v668_v51 = vpop.permute.xlu0 %667  ;;  %v846_v52 = vpop.permute.xlu1 %845 }
 0x154   : > { %696 = vst.msk [vmem:[#allocation3 + $0x30] sm:$0x3] %vm695_vm0, %v668_v51  ;;  %v1034_v53 = vpop.permute.xlu2 %1033 }
 0x155   : > { %877 = vst.msk [vmem:[#allocation3 + $0x20] sm:$0xf] %vm868_vm10, %v846_v52 }
 0x156   : > { %1064 = vst.msk [vmem:[#allocation3 + $0x24] sm:$0xf] %vm1054_vm13, %v1034_v53 }
 0x15b   : > { %v761_v54 = vpop.permute.xlu0 %760  ;;  %v939_v55 = vpop.permute.xlu1 %938 }
 0x15c   : > { %789 = vst.msk [vmem:[#allocation3 + $0x30] sm:$0x3] %vm788_vm1, %v761_v54  ;;  %v650_v56 = vpop.permute.xlu2 %649 }
 0x15d   : > { %970 = vst.msk [vmem:[#allocation3 + $0x20] sm:$0xf] %vm961_vm12, %v939_v55 }
 0x15e   : > { %686 = vst.msk [vmem:[#allocation3 + $0xc] sm:$0xf] %vm682_vm8, %v650_v56 }
 0x163   : > { %v854_v57 = vpop.permute.xlu0 %853  ;;  %v1032_v58 = vpop.permute.xlu1 %1031 }
 0x164   : > { %882 = vst.msk [vmem:[#allocation3 + $0x30] sm:$0x3] %vm881_vm2, %v854_v57  ;;  %v947_v59 = vpop.permute.xlu2 %946 }
 0x165   : > { %1063 = vst.msk [vmem:[#allocation3 + $0x20] sm:$0xf] %vm1054_vm13, %v1032_v58 }
 0x166   : > { %975 = vst.msk [vmem:[#allocation3 + $0x30] sm:$0x3] %vm974_vm3, %v947_v59 }
 0x16b   : > { %v656_v22 = vpop.permute.xlu0 %655  ;;  %v648_v60 = vpop.permute.xlu1 %647 }
 0x16c   : > { %v1380_v62 = vld [vmem:[#allocation3 + $0x20] sm:$0xff]  ;;  %689 = vst.msk [vmem:[#allocation3 + $0x18] sm:$0xf] %vm682_vm8, %v656_v22  ;;  %v749_v63 = vpop.permute.xlu2 %748 }
 0x16d   : > { %685 = vst.msk [vmem:[#allocation3 + $0x8] sm:$0xf] %vm682_vm8, %v648_v60  ;;  %1371 = vmatmul.msk.bf16.vlgmr.msra.gmra.mxu2 %vm1139_vm14, %v1380_v62 }
 0x16e   : > { %782 = vst.msk [vmem:[#allocation3 + $0x18] sm:$0xf] %vm775_vm9, %v749_v63 }
 0x173   : > { %v741_v1 = vpop.permute.xlu0 %740  ;;  %v658_v2 = vpop.permute.xlu1 %657 }
 0x174   : > { %778 = vst.msk [vmem:[#allocation3 + $0x8] sm:$0xf] %vm775_vm9, %v741_v1  ;;  %v834_v3 = vpop.permute.xlu2 %833 }
 0x175   : > { %690 = vst.msk [vmem:[#allocation3 + $0x1c] sm:$0xf] %vm682_vm8, %v658_v2 }
 0x176   : > { %871 = vst.msk [vmem:[#allocation3 + $0x8] sm:$0xf] %vm868_vm10, %v834_v3 }
 0x17b   : > { %v751_v4 = vpop.permute.xlu0 %750  ;;  %v743_v5 = vpop.permute.xlu1 %742 }
 0x17c   : > { %783 = vst.msk [vmem:[#allocation3 + $0x1c] sm:$0xf] %vm775_vm9, %v751_v4  ;;  %v844_v6 = vpop.permute.xlu2 %843 }
 0x17d   : > { %779 = vst.msk [vmem:[#allocation3 + $0xc] sm:$0xf] %vm775_vm9, %v743_v5 }
 0x17e   : > { %876 = vst.msk [vmem:[#allocation3 + $0x1c] sm:$0xf] %vm868_vm10, %v844_v6 }
 0x183   : > { %v836_v7 = vpop.permute.xlu0 %835  ;;  %v1040_v8 = vpop.permute.xlu1 %1039 }
 0x184   : > { %872 = vst.msk [vmem:[#allocation3 + $0xc] sm:$0xf] %vm868_vm10, %v836_v7  ;;  %v935_v9 = vpop.permute.xlu2 %934 }
 0x185   : > { %1068 = vst.msk [vmem:[#allocation3 + $0x30] sm:$0x3] %vm1067_vm4, %v1040_v8 }
 0x18b   : > { %v927_v12 = vpop.permute.xlu0 %926  ;;  %v842_v15 = vpop.permute.xlu1 %841 }
 0x18c   : > { %v1081_v10 = vld [vmem:[#allocation3 + $0x30] sm:$0x3]  ;;  %964 = vst.msk [vmem:[#allocation3 + $0x8] sm:$0xf] %vm961_vm12, %v927_v12  ;;  %v1022_v14 = vpop.permute.xlu2 %1021 }
 0x18d   : > { %875 = vst.msk [vmem:[#allocation3 + $0x18] sm:$0xf] %vm868_vm10, %v842_v15  ;;  %v1116_v21 = vunpack.c.l.b16 %v1081_v10 }
 0x18e   : > { %968 = vst.msk [vmem:[#allocation3 + $0x18] sm:$0xf] %vm961_vm12, %v935_v9 }
 0x18f   : > { %v1123_v13 = vpack.c.b16 %v1116_v21, %v1116_v21 }
 0x191   : > { %1373 = vmatmul.msk.bf16.gmra.mxu3 %vm1139_vm14, %v1123_v13 }
 0x193   : > { %v937_v16 = vpop.permute.xlu0 %936  ;;  %v929_v17 = vpop.permute.xlu1 %928 }
 0x194   : > { %969 = vst.msk [vmem:[#allocation3 + $0x1c] sm:$0xf] %vm961_vm12, %v937_v16 }
 0x195   : > { %965 = vst.msk [vmem:[#allocation3 + $0xc] sm:$0xf] %vm961_vm12, %v929_v17 }
 0x196   : > { %1058 = vst.msk [vmem:[#allocation3 + $0xc] sm:$0xf] %vm1054_vm13, %v1022_v14 }
 0x19b   : > { %v1028_v18 = vpop.permute.xlu0 %1027  ;;  %v1020_v19 = vpop.permute.xlu1 %1019 }
 0x19c   : > { %1061 = vst.msk [vmem:[#allocation3 + $0x18] sm:$0xf] %vm1054_vm13, %v1028_v18 }
 0x19d   : > { %1057 = vst.msk [vmem:[#allocation3 + $0x8] sm:$0xf] %vm1054_vm13, %v1020_v19 }
 0x1a3   : > { %v1030_v20 = vpop.permute.xlu1 %1029 }
 0x1a4   : > { %v1377_v0 = vld [vmem:[#allocation3 + $0x8] sm:$0xff]  ;;  %1062 = vst.msk [vmem:[#allocation3 + $0x1c] sm:$0xf] %vm1054_vm13, %v1030_v20 }
 0x1a5   : > { %1368 = vmatmul.msk.bf16.gmra.mxu0 %vm1139_vm14, %v1377_v0 }
 0x1ab   : > { %v1379_v23 = vld [vmem:[#allocation3 + $0x18] sm:$0xff] }
 0x1ac   : > { %1370 = vmatmul.msk.bf16.gmra.mxu1 %vm1139_vm14, %v1379_v23 }
 0x1c0   : > { %v1199_v25 = vpop.f32.mrf.mxu3 }
 0x1c1   : > { %v1200_v26 = vadd.f32 %v1412_v24, %v1199_v25  ;;  %v1184_v27 = vpop.f32.mrf.mxu1 }
 0x1c2   : > { %v1174_v28 = vpop.f32.mrf.mxu0  ;;  %v1185_v29 = vadd.f32 %v1412_v24, %v1184_v27 }
 0x1c3   : > { %v1218_v30 = vmax.f32 %v1200_v26, 0.0  ;;  %v1175_v31 = vadd.f32 %v1412_v24, %v1174_v28 }
 0x1c4   : > { %v1212_v32 = vmax.f32 %v1185_v29, 0.0 }
 0x1c5   : > { %1231 = vst [vmem:[%s1802_s10 + $0x50] sm:$0xff] %v1218_v30  ;;  %v1208_v11 = vmax.f32 %v1175_v31, 0.0 }
 0x1c6   : > { %1225 = vst [vmem:[%s1802_s10 + $0x20] sm:$0xff] %v1212_v32 }
 0x1c7   : > { %1221 = vst [vmem:[%s1802_s10] sm:$0xff] %v1208_v11 }
 0x1c8   : > { %v1201_v33 = vpop.f32.mrf.mxu3 }
 0x1c9   : > { %v1202_v34 = vadd.f32 %v1412_v24, %v1201_v33  ;;  %v1186_v35 = vpop.f32.mrf.mxu1 }
 0x1ca   : > { %v1176_v36 = vpop.f32.mrf.mxu0  ;;  %v1187_v61 = vadd.f32 %v1412_v24, %v1186_v35 }
 0x1cb   : > { %v1219_v37 = vmax.f32 %v1202_v34, 0.0  ;;  %v1177_v38 = vadd.f32 %v1412_v24, %v1176_v36 }
 0x1cc   : > { %v1213_v39 = vmax.f32 %v1187_v61, 0.0 }
 0x1cd   : > { %1232 = vst [vmem:[%s1802_s10 + $0x58] sm:$0xff] %v1219_v37  ;;  %v1209_v40 = vmax.f32 %v1177_v38, 0.0 }
 0x1ce   : > { %1226 = vst [vmem:[%s1802_s10 + $0x28] sm:$0xff] %v1213_v39 }
 0x1cf   : > { %1222 = vst [vmem:[%s1802_s10 + $0x8] sm:$0xff] %v1209_v40 }
 0x1f0   : > { %v1194_v41 = vpop.f32.mrf.mxu2 }
 0x1f1   : > { %v1195_v42 = vadd.f32 %v1412_v24, %v1194_v41 }
 0x1f3   : > { %v1216_v43 = vmax.f32 %v1195_v42, 0.0 }
 0x1f5   : > { %1229 = vst [vmem:[%s1802_s10 + $0x40] sm:$0xff] %v1216_v43 }
 0x1f8   : > { %v1196_v44 = vpop.f32.mrf.mxu2 }
 0x1f9   : > { %v1197_v45 = vadd.f32 %v1412_v24, %v1196_v44 }
 0x1fb   : > { %v1217_v46 = vmax.f32 %v1197_v45, 0.0 }
 0x1fd   : > { %1230 = vst [vmem:[%s1802_s10 + $0x48] sm:$0xff] %v1217_v46 }
 0x214   : > { %v1204_v47 = vpop.f32.mrf.mxu3 }
 0x215   : > { %v1205_v48 = vadd.f32 %v1412_v24, %v1204_v47 }
 0x217   : > { %v1220_v49 = vmax.f32 %v1205_v48, 0.0 }
 0x219   : > { %1233 = vst [vmem:[%s1802_s10 + $0x60] sm:$0xf] %v1220_v49 }
 0x21c   : > { %v1206_v50 = vpop.f32.mrf.mxu3 }
 0x222   : > { %v1179_v51 = vpop.f32.mrf.mxu0 }
 0x223   : > { %v1180_v52 = vadd.f32 %v1412_v24, %v1179_v51 }
 0x225   : > { %v1210_v53 = vmax.f32 %v1180_v52, 0.0 }
 0x227   : > { %1223 = vst [vmem:[%s1802_s10 + $0x10] sm:$0xff] %v1210_v53 }
 0x229   : > { %v1189_v55 = vpop.f32.mrf.mxu1 }
 0x22a   : > { %v1181_v54 = vpop.f32.mrf.mxu0  ;;  %v1190_v57 = vadd.f32 %v1412_v24, %v1189_v55 }
 0x22b   : > { %v1182_v56 = vadd.f32 %v1412_v24, %v1181_v54 }
 0x22c   : > { %v1214_v59 = vmax.f32 %v1190_v57, 0.0 }
 0x22d   : > { %v1211_v58 = vmax.f32 %v1182_v56, 0.0 }
 0x22e   : > { %1227 = vst [vmem:[%s1802_s10 + $0x30] sm:$0xff] %v1214_v59 }
 0x22f   : > { %1224 = vst [vmem:[%s1802_s10 + $0x18] sm:$0xff] %v1211_v58 }
 0x231   : > { %v1191_v22 = vpop.f32.mrf.mxu1 }
 0x232   : > { %v1192_v60 = vadd.f32 %v1412_v24, %v1191_v22 }
 0x234   : > { %v1215_v62 = vmax.f32 %v1192_v60, 0.0 }
 0x236   : > { %1228 = vst [vmem:[%s1802_s10 + $0x38] sm:$0xff] %v1215_v62 }
 0x237 PF: > { %s13_s12 = sadd.s32 1, %s1419_s12  }
 0x238   : > { %p10_p4 = scmp.ge.s32.totalorder %s13_s12, 4  }
 0x23a   :  { %12 = sbr.rel (!%p10_p4) target bundleno = 1 (0x1), region = 65 }

</bundles_post_ra>
